<compile_context>
chip_gen: v5e
topology: v5e:2x2
jax: 0.10.0
libtpu: 0.0.40
codegen_flags: <defaults>
</compile_context>

<pallas_src>
import jax
import jax.numpy as jnp
from jax.experimental import pallas as pl
from jax.experimental.pallas import tpu as pltpu
import numpy as np

# ----------------------- config (matches module __init__) -----------------------
INPUT_DIM = 3          # "3dim" problem
HIDDEN_DIM = 32        # config['model']['hidden_dim']
NUM_LAYERS = 2         # config['model']['num_layers']
# USE_BASIC_SOLVER = True  -> basic_euler_ode_solver path
# TODO(synk): the odeint (torchdiffeq) branch is not implemented; only the
#             basic Euler solver path used by the experiment is translated.

_LANE = 128


def _softplus(x):
    # Numerically stable softplus, matches torch.nn.Softplus (beta=1).
    return jnp.maximum(x, 0.0) + jnp.log1p(jnp.exp(-jnp.abs(x)))


def _make_kernel(num_linear, num_steps, input_dim):
    """Kernel closed over static layer count / step count / input dim."""
    num_mid = num_linear - 2  # number of HxH hidden layers

    def kernel(t_ref, y_ref, *refs):
        # refs = (w_inT(H,D), b_in(H,1),
        #         [w_midT(H,H), b_mid(H,1)] * num_mid,
        #         w_out(H,D),  b_out(D,1),
        #         out_ref(D, TILE_B))
        out_ref = refs[-1]
        wb = refs[:-1]
        tile_b = y_ref.shape[1]

        # ---------------- hoisted: loads, slices, broadcasts, dt ----------------
        ones_row = jnp.ones((1, tile_b), jnp.float32)

        w_in = wb[0][...]                       # (H, D)
        b_in = wb[1][...]                       # (H, 1)
        mids = []
        for k in range(num_mid):
            w_t = wb[2 + 2 * k][...]            # (H, H)  (already transposed)
            b_b = wb[3 + 2 * k][...] * ones_row  # (H, TILE_B) pre-broadcast
            mids.append((w_t, b_b))
        w_out = wb[2 + 2 * num_mid][...]        # (H, D)
        b_out = wb[3 + 2 * num_mid][...]        # (D, 1)

        # Pre-broadcast weight columns / biases once (JAX does not CSE broadcasts).
        w_in_cols = [w_in[:, d:d + 1] * ones_row for d in range(input_dim)]   # (H,TILE_B)
        w_out_cols = [w_out[:, d:d + 1] * ones_row for d in range(input_dim)]  # (H,TILE_B)
        b_in_b = b_in * ones_row                                               # (H,TILE_B)
        b_out_rows = [b_out[d:d + 1, :] * ones_row for d in range(input_dim)]  # (1,TILE_B)

        dt = t_ref[1] - t_ref[0]                # constant dt (torch basic solver)
        dt_row = dt * ones_row                  # pre-broadcast scalar splat

        # State kept as D separate (1, TILE_B) lane-dense rows (batch on lanes).
        y_rows = [y_ref[d:d + 1, :] for d in range(input_dim)]

        # ---------------- fully unrolled Euler integration ----------------
        for _ in range(num_steps):
            # Input projection (D -> H) on the VPU: 3 broadcast-multiply-adds.
            h = b_in_b + w_in_cols[0] * y_rows[0]
            for d in range(1, input_dim):
                h = h + w_in_cols[d] * y_rows[d]
            h = jnp.tanh(h)

            # Hidden HxH layer(s) on the MXU.
            for w_t, b_b in mids:
                h = jnp.dot(w_t, h, preferred_element_type=jnp.float32) + b_b
                h = _softplus(h)

            # Output projection (H -> D): multiply + sublane reduce, no MXU.
            y_rows = [
                y_rows[d]
                + (jnp.sum(w_out_cols[d] * h, axis=0, keepdims=True)
                   + b_out_rows[d]) * dt_row
                for d in range(input_dim)
            ]

        for d in range(input_dim):
            out_ref[d:d + 1, :] = y_rows[d]

    return kernel


def neural_ode_forward(y0, t, params):
    """Euler-integrate the ODEFunc MLP and return the final state.

    y0: (B, 1, D) float32, t: (T,) float32, params: list of (W, b) pairs with
    W stored as (fan_in, fan_out).  Returns (B, 1, D) float32 — equivalent to
    torch `out[-1, :, :, :]`.
    """
    B, one, D = y0.shape
    rows = B * one
    H = params[0][0].shape[1]
    num_linear = len(params)
    assert num_linear >= 2
    T = int(t.shape[0])
    num_steps = T - 1

    # Lane-dense layout: state is (feature, batch); pad batch to 128 lanes.
    b_pad = max(_LANE, ((rows + _LANE - 1) // _LANE) * _LANE)
    tile_b = next(tb for tb in (512, 256, 128) if b_pad % tb == 0)
    grid = (b_pad // tile_b,)

    y_t = jnp.zeros((D, b_pad), jnp.float32)
    y_t = y_t.at[:, :rows].set(y0.reshape(rows, D).astype(jnp.float32).T)
    t = t.astype(jnp.float32)

    kernel_args = []
    in_specs = [
        pl.BlockSpec(memory_space=pltpu.MemorySpace.SMEM),        # t (scalars)
        pl.BlockSpec((D, tile_b), lambda i: (0, i)),              # y0, tiled on lanes
    ]

    def add_full(arr):
        arr = jnp.asarray(arr, jnp.float32)
        kernel_args.append(arr)
        in_specs.append(pl.BlockSpec(arr.shape, lambda i: (0, 0)))

    w_in, bias_in = params[0]
    add_full(w_in.T)                    # (H, D)
    add_full(bias_in.reshape(H, 1))     # (H, 1)
    for w, bias in params[1:-1]:
        add_full(w.T)                   # (H, H): h_new = w.T @ h
        add_full(bias.reshape(H, 1))    # (H, 1)
    w_out, bias_out = params[-1]
    add_full(w_out)                     # (H, D): column d -> output feature d
    add_full(bias_out.reshape(D, 1))    # (D, 1)

    kernel = _make_kernel(num_linear, num_steps, D)

    out_t = pl.pallas_call(
        kernel,
        out_shape=jax.ShapeDtypeStruct((D, b_pad), jnp.float32),
        grid=grid,
        in_specs=in_specs,
        out_specs=pl.BlockSpec((D, tile_b), lambda i: (0, i)),
        compiler_params=pltpu.CompilerParams(
            dimension_semantics=("parallel",)),
    )(t, y_t, *kernel_args)

    return out_t.T[:rows].reshape(B, one, D)


def init_params(key, input_dim, hidden_dim, num_layers):
    """Deterministic init mirroring nn.Linear's U(-1/sqrt(fan_in), 1/sqrt(fan_in))."""
    dims = [input_dim] + [hidden_dim] * num_layers + [input_dim]
    params = []
    for i in range(len(dims) - 1):
        fan_in, fan_out = dims[i], dims[i + 1]
        key, kw, kb = jax.random.split(key, 3)
        bound = 1.0 / np.sqrt(fan_in)
        w = jax.random.uniform(kw, (fan_in, fan_out), jnp.float32, -bound, bound)
        b = jax.random.uniform(kb, (fan_out,), jnp.float32, -bound, bound)
        params.append((w, b))
    return params


def reference_forward(y0, t, params):
    """Pure-JAX reference of basic_euler_ode_solver + MLP (constant dt, as torch)."""
    def mlp(y):
        h = y
        n = len(params)
        for li, (w, b) in enumerate(params):
            h = h @ w + b
            if li == 0:
                h = jnp.tanh(h)
            elif li < n - 1:
                h = _softplus(h)
        return h

    dt = t[1] - t[0]
    y = y0
    for _ in range(t.shape[0] - 1):
        y = y + mlp(y) * dt
    return y


if __name__ == "__main__":
    key = jax.random.PRNGKey(0)
    kp, ky = jax.random.split(key)

    B, T = 2, 8
    params = init_params(kp, INPUT_DIM, HIDDEN_DIM, NUM_LAYERS)

    # y0: (batch, 1, input_dim) — matches the torch usage.
    y0 = jax.random.normal(ky, (B, 1, INPUT_DIM), jnp.float32)
    t = jnp.linspace(0.0, 1.0, T, dtype=jnp.float32)

    out = neural_ode_forward(y0, t, params)
    out = jax.block_until_ready(out)

    ref = reference_forward(y0, t, params)
    np.testing.assert_allclose(np.asarray(out), np.asarray(ref), rtol=1e-4, atol=1e-5)

    assert out.shape == (B, 1, INPUT_DIM)
    print("KERNEL_OK")
</pallas_src>

<mosaic_0001>
module attributes {stable_mosaic.version = 11 : i64} {
  func.func @kernel(%arg0: i32, %arg1: memref<8xf32, #tpu.memory_space<smem>>, %arg2: memref<3x128xf32, #tpu.memory_space<vmem>>, %arg3: memref<32x3xf32, #tpu.memory_space<vmem>>, %arg4: memref<32x1xf32, #tpu.memory_space<vmem>>, %arg5: memref<32x32xf32, #tpu.memory_space<vmem>>, %arg6: memref<32x1xf32, #tpu.memory_space<vmem>>, %arg7: memref<32x3xf32, #tpu.memory_space<vmem>>, %arg8: memref<3x1xf32, #tpu.memory_space<vmem>>, %arg9: memref<3x128xf32, #tpu.memory_space<vmem>>) attributes {dimension_semantics = [#tpu.dimension_semantics<parallel>], iteration_bounds = array<i64: 1>, scalar_prefetch = 0 : i64, scratch_operands = 0 : i64, tpu.core_type = #tpu.core_type<tc>, window_params = [{transform_indices = @transform_0, window_bounds = array<i64: 8>}, {transform_indices = @transform_1, window_bounds = array<i64: 3, 128>}, {pipeline_mode = #tpu.pipeline_mode<synchronous>, transform_indices = @transform_2, window_bounds = array<i64: 32, 3>}, {pipeline_mode = #tpu.pipeline_mode<synchronous>, transform_indices = @transform_3, window_bounds = array<i64: 32, 1>}, {pipeline_mode = #tpu.pipeline_mode<synchronous>, transform_indices = @transform_4, window_bounds = array<i64: 32, 32>}, {pipeline_mode = #tpu.pipeline_mode<synchronous>, transform_indices = @transform_5, window_bounds = array<i64: 32, 1>}, {pipeline_mode = #tpu.pipeline_mode<synchronous>, transform_indices = @transform_6, window_bounds = array<i64: 32, 3>}, {pipeline_mode = #tpu.pipeline_mode<synchronous>, transform_indices = @transform_7, window_bounds = array<i64: 3, 1>}, {transform_indices = @transform_8, window_bounds = array<i64: 3, 128>}]} {
    %cst = arith.constant 1.000000e+00 : f32
    %0 = vector.broadcast %cst : f32 to vector<1x128xf32>
    %c0 = arith.constant 0 : index
    %c0_0 = arith.constant 0 : index
    %1 = vector.load %arg3[%c0, %c0_0] : memref<32x3xf32, #tpu.memory_space<vmem>>, vector<32x3xf32>
    %c0_1 = arith.constant 0 : index
    %c0_2 = arith.constant 0 : index
    %2 = vector.load %arg4[%c0_1, %c0_2] : memref<32x1xf32, #tpu.memory_space<vmem>>, vector<32x1xf32>
    %c0_3 = arith.constant 0 : index
    %c0_4 = arith.constant 0 : index
    %3 = vector.load %arg5[%c0_3, %c0_4] : memref<32x32xf32, #tpu.memory_space<vmem>>, vector<32x32xf32>
    %c0_5 = arith.constant 0 : index
    %c0_6 = arith.constant 0 : index
    %4 = vector.load %arg6[%c0_5, %c0_6] : memref<32x1xf32, #tpu.memory_space<vmem>>, vector<32x1xf32>
    %5 = vector.broadcast %4 : vector<32x1xf32> to vector<32x128xf32>
    %6 = vector.broadcast %0 : vector<1x128xf32> to vector<32x128xf32>
    %7 = arith.mulf %5, %6 : vector<32x128xf32>
    %c0_7 = arith.constant 0 : index
    %c0_8 = arith.constant 0 : index
    %8 = vector.load %arg7[%c0_7, %c0_8] : memref<32x3xf32, #tpu.memory_space<vmem>>, vector<32x3xf32>
    %c0_9 = arith.constant 0 : index
    %c0_10 = arith.constant 0 : index
    %9 = vector.load %arg8[%c0_9, %c0_10] : memref<3x1xf32, #tpu.memory_space<vmem>>, vector<3x1xf32>
    %10 = vector.extract_strided_slice %1 {offsets = [0, 0], sizes = [32, 1], strides = [1, 1]} : vector<32x3xf32> to vector<32x1xf32>
    %11 = vector.broadcast %10 : vector<32x1xf32> to vector<32x128xf32>
    %12 = vector.broadcast %0 : vector<1x128xf32> to vector<32x128xf32>
    %13 = arith.mulf %11, %12 : vector<32x128xf32>
    %14 = vector.extract_strided_slice %1 {offsets = [0, 1], sizes = [32, 1], strides = [1, 1]} : vector<32x3xf32> to vector<32x1xf32>
    %15 = vector.broadcast %14 : vector<32x1xf32> to vector<32x128xf32>
    %16 = vector.broadcast %0 : vector<1x128xf32> to vector<32x128xf32>
    %17 = arith.mulf %15, %16 : vector<32x128xf32>
    %18 = vector.extract_strided_slice %1 {offsets = [0, 2], sizes = [32, 1], strides = [1, 1]} : vector<32x3xf32> to vector<32x1xf32>
    %19 = vector.broadcast %18 : vector<32x1xf32> to vector<32x128xf32>
    %20 = vector.broadcast %0 : vector<1x128xf32> to vector<32x128xf32>
    %21 = arith.mulf %19, %20 : vector<32x128xf32>
    %22 = vector.extract_strided_slice %8 {offsets = [0, 0], sizes = [32, 1], strides = [1, 1]} : vector<32x3xf32> to vector<32x1xf32>
    %23 = vector.broadcast %22 : vector<32x1xf32> to vector<32x128xf32>
    %24 = vector.broadcast %0 : vector<1x128xf32> to vector<32x128xf32>
    %25 = arith.mulf %23, %24 : vector<32x128xf32>
    %26 = vector.extract_strided_slice %8 {offsets = [0, 1], sizes = [32, 1], strides = [1, 1]} : vector<32x3xf32> to vector<32x1xf32>
    %27 = vector.broadcast %26 : vector<32x1xf32> to vector<32x128xf32>
    %28 = vector.broadcast %0 : vector<1x128xf32> to vector<32x128xf32>
    %29 = arith.mulf %27, %28 : vector<32x128xf32>
    %30 = vector.extract_strided_slice %8 {offsets = [0, 2], sizes = [32, 1], strides = [1, 1]} : vector<32x3xf32> to vector<32x1xf32>
    %31 = vector.broadcast %30 : vector<32x1xf32> to vector<32x128xf32>
    %32 = vector.broadcast %0 : vector<1x128xf32> to vector<32x128xf32>
    %33 = arith.mulf %31, %32 : vector<32x128xf32>
    %34 = vector.broadcast %2 : vector<32x1xf32> to vector<32x128xf32>
    %35 = vector.broadcast %0 : vector<1x128xf32> to vector<32x128xf32>
    %36 = arith.mulf %34, %35 : vector<32x128xf32>
    %37 = vector.extract_strided_slice %9 {offsets = [0, 0], sizes = [1, 1], strides = [1, 1]} : vector<3x1xf32> to vector<1x1xf32>
    %38 = vector.broadcast %37 : vector<1x1xf32> to vector<1x128xf32>
    %39 = arith.mulf %38, %0 : vector<1x128xf32>
    %40 = vector.extract_strided_slice %9 {offsets = [1, 0], sizes = [1, 1], strides = [1, 1]} : vector<3x1xf32> to vector<1x1xf32>
    %41 = vector.broadcast %40 : vector<1x1xf32> to vector<1x128xf32>
    %42 = arith.mulf %41, %0 : vector<1x128xf32>
    %43 = vector.extract_strided_slice %9 {offsets = [2, 0], sizes = [1, 1], strides = [1, 1]} : vector<3x1xf32> to vector<1x1xf32>
    %44 = vector.broadcast %43 : vector<1x1xf32> to vector<1x128xf32>
    %45 = arith.mulf %44, %0 : vector<1x128xf32>
    %c1 = arith.constant 1 : index
    %46 = memref.load %arg1[%c1] : memref<8xf32, #tpu.memory_space<smem>>
    %c0_11 = arith.constant 0 : index
    %47 = memref.load %arg1[%c0_11] : memref<8xf32, #tpu.memory_space<smem>>
    %48 = arith.subf %46, %47 : f32
    %49 = vector.broadcast %48 : f32 to vector<1x128xf32>
    %50 = arith.mulf %49, %0 : vector<1x128xf32>
    %c0_12 = arith.constant 0 : index
    %c0_13 = arith.constant 0 : index
    %51 = vector.load %arg2[%c0_12, %c0_13] : memref<3x128xf32, #tpu.memory_space<vmem>>, vector<1x128xf32>
    %c1_14 = arith.constant 1 : index
    %c0_15 = arith.constant 0 : index
    %52 = vector.load %arg2[%c1_14, %c0_15] : memref<3x128xf32, #tpu.memory_space<vmem>>, vector<1x128xf32>
    %c2 = arith.constant 2 : index
    %c0_16 = arith.constant 0 : index
    %53 = vector.load %arg2[%c2, %c0_16] : memref<3x128xf32, #tpu.memory_space<vmem>>, vector<1x128xf32>
    %54 = vector.broadcast %51 : vector<1x128xf32> to vector<32x128xf32>
    %55 = arith.mulf %13, %54 : vector<32x128xf32>
    %56 = arith.addf %36, %55 : vector<32x128xf32>
    %57 = vector.broadcast %52 : vector<1x128xf32> to vector<32x128xf32>
    %58 = arith.mulf %17, %57 : vector<32x128xf32>
    %59 = arith.addf %56, %58 : vector<32x128xf32>
    %60 = vector.broadcast %53 : vector<1x128xf32> to vector<32x128xf32>
    %61 = arith.mulf %21, %60 : vector<32x128xf32>
    %62 = arith.addf %59, %61 : vector<32x128xf32>
    %63 = math.tanh %62 : vector<32x128xf32>
    %cst_17 = arith.constant dense<0.000000e+00> : vector<32x128xf32>
    %64 = tpu.matmul %3, %63, %cst_17 {dimension_numbers = #tpu.dot_dimension_numbers<[1], [0], [0], [1], [0, 0, 1, 1], [], []>} : vector<32x32xf32>, vector<32x128xf32>, vector<32x128xf32> -> vector<32x128xf32>
    %65 = arith.addf %64, %7 : vector<32x128xf32>
    %cst_18 = arith.constant 0.000000e+00 : f32
    %66 = vector.broadcast %cst_18 : f32 to vector<32x128xf32>
    %67 = arith.maximumf %65, %66 : vector<32x128xf32>
    %68 = math.absf %65 : vector<32x128xf32>
    %cst_19 = arith.constant 0.000000e+00 : f32
    %69 = vector.broadcast %cst_19 : f32 to vector<32x128xf32>
    %70 = arith.subf %69, %68 : vector<32x128xf32>
    %71 = math.exp %70 : vector<32x128xf32>
    %72 = math.log1p %71 : vector<32x128xf32>
    %73 = arith.addf %67, %72 : vector<32x128xf32>
    %74 = arith.mulf %25, %73 : vector<32x128xf32>
    %cst_20 = arith.constant dense<0.000000e+00> : vector<128xf32>
    %75 = vector.multi_reduction <add>, %74, %cst_20 [0] : vector<32x128xf32> to vector<128xf32>
    %76 = vector.shape_cast %75 : vector<128xf32> to vector<1x128xf32>
    %77 = arith.addf %76, %39 : vector<1x128xf32>
    %78 = arith.mulf %77, %50 : vector<1x128xf32>
    %79 = arith.addf %51, %78 : vector<1x128xf32>
    %80 = arith.mulf %29, %73 : vector<32x128xf32>
    %cst_21 = arith.constant dense<0.000000e+00> : vector<128xf32>
    %81 = vector.multi_reduction <add>, %80, %cst_21 [0] : vector<32x128xf32> to vector<128xf32>
    %82 = vector.shape_cast %81 : vector<128xf32> to vector<1x128xf32>
    %83 = arith.addf %82, %42 : vector<1x128xf32>
    %84 = arith.mulf %83, %50 : vector<1x128xf32>
    %85 = arith.addf %52, %84 : vector<1x128xf32>
    %86 = arith.mulf %33, %73 : vector<32x128xf32>
    %cst_22 = arith.constant dense<0.000000e+00> : vector<128xf32>
    %87 = vector.multi_reduction <add>, %86, %cst_22 [0] : vector<32x128xf32> to vector<128xf32>
    %88 = vector.shape_cast %87 : vector<128xf32> to vector<1x128xf32>
    %89 = arith.addf %88, %45 : vector<1x128xf32>
    %90 = arith.mulf %89, %50 : vector<1x128xf32>
    %91 = arith.addf %53, %90 : vector<1x128xf32>
    %92 = vector.broadcast %79 : vector<1x128xf32> to vector<32x128xf32>
    %93 = arith.mulf %13, %92 : vector<32x128xf32>
    %94 = arith.addf %36, %93 : vector<32x128xf32>
    %95 = vector.broadcast %85 : vector<1x128xf32> to vector<32x128xf32>
    %96 = arith.mulf %17, %95 : vector<32x128xf32>
    %97 = arith.addf %94, %96 : vector<32x128xf32>
    %98 = vector.broadcast %91 : vector<1x128xf32> to vector<32x128xf32>
    %99 = arith.mulf %21, %98 : vector<32x128xf32>
    %100 = arith.addf %97, %99 : vector<32x128xf32>
    %101 = math.tanh %100 : vector<32x128xf32>
    %cst_23 = arith.constant dense<0.000000e+00> : vector<32x128xf32>
    %102 = tpu.matmul %3, %101, %cst_23 {dimension_numbers = #tpu.dot_dimension_numbers<[1], [0], [0], [1], [0, 0, 1, 1], [], []>} : vector<32x32xf32>, vector<32x128xf32>, vector<32x128xf32> -> vector<32x128xf32>
    %103 = arith.addf %102, %7 : vector<32x128xf32>
    %cst_24 = arith.constant 0.000000e+00 : f32
    %104 = vector.broadcast %cst_24 : f32 to vector<32x128xf32>
    %105 = arith.maximumf %103, %104 : vector<32x128xf32>
    %106 = math.absf %103 : vector<32x128xf32>
    %cst_25 = arith.constant 0.000000e+00 : f32
    %107 = vector.broadcast %cst_25 : f32 to vector<32x128xf32>
    %108 = arith.subf %107, %106 : vector<32x128xf32>
    %109 = math.exp %108 : vector<32x128xf32>
    %110 = math.log1p %109 : vector<32x128xf32>
    %111 = arith.addf %105, %110 : vector<32x128xf32>
    %112 = arith.mulf %25, %111 : vector<32x128xf32>
    %cst_26 = arith.constant dense<0.000000e+00> : vector<128xf32>
    %113 = vector.multi_reduction <add>, %112, %cst_26 [0] : vector<32x128xf32> to vector<128xf32>
    %114 = vector.shape_cast %113 : vector<128xf32> to vector<1x128xf32>
    %115 = arith.addf %114, %39 : vector<1x128xf32>
    %116 = arith.mulf %115, %50 : vector<1x128xf32>
    %117 = arith.addf %79, %116 : vector<1x128xf32>
    %118 = arith.mulf %29, %111 : vector<32x128xf32>
    %cst_27 = arith.constant dense<0.000000e+00> : vector<128xf32>
    %119 = vector.multi_reduction <add>, %118, %cst_27 [0] : vector<32x128xf32> to vector<128xf32>
    %120 = vector.shape_cast %119 : vector<128xf32> to vector<1x128xf32>
    %121 = arith.addf %120, %42 : vector<1x128xf32>
    %122 = arith.mulf %121, %50 : vector<1x128xf32>
    %123 = arith.addf %85, %122 : vector<1x128xf32>
    %124 = arith.mulf %33, %111 : vector<32x128xf32>
    %cst_28 = arith.constant dense<0.000000e+00> : vector<128xf32>
    %125 = vector.multi_reduction <add>, %124, %cst_28 [0] : vector<32x128xf32> to vector<128xf32>
    %126 = vector.shape_cast %125 : vector<128xf32> to vector<1x128xf32>
    %127 = arith.addf %126, %45 : vector<1x128xf32>
    %128 = arith.mulf %127, %50 : vector<1x128xf32>
    %129 = arith.addf %91, %128 : vector<1x128xf32>
    %130 = vector.broadcast %117 : vector<1x128xf32> to vector<32x128xf32>
    %131 = arith.mulf %13, %130 : vector<32x128xf32>
    %132 = arith.addf %36, %131 : vector<32x128xf32>
    %133 = vector.broadcast %123 : vector<1x128xf32> to vector<32x128xf32>
    %134 = arith.mulf %17, %133 : vector<32x128xf32>
    %135 = arith.addf %132, %134 : vector<32x128xf32>
    %136 = vector.broadcast %129 : vector<1x128xf32> to vector<32x128xf32>
    %137 = arith.mulf %21, %136 : vector<32x128xf32>
    %138 = arith.addf %135, %137 : vector<32x128xf32>
    %139 = math.tanh %138 : vector<32x128xf32>
    %cst_29 = arith.constant dense<0.000000e+00> : vector<32x128xf32>
    %140 = tpu.matmul %3, %139, %cst_29 {dimension_numbers = #tpu.dot_dimension_numbers<[1], [0], [0], [1], [0, 0, 1, 1], [], []>} : vector<32x32xf32>, vector<32x128xf32>, vector<32x128xf32> -> vector<32x128xf32>
    %141 = arith.addf %140, %7 : vector<32x128xf32>
    %cst_30 = arith.constant 0.000000e+00 : f32
    %142 = vector.broadcast %cst_30 : f32 to vector<32x128xf32>
    %143 = arith.maximumf %141, %142 : vector<32x128xf32>
    %144 = math.absf %141 : vector<32x128xf32>
    %cst_31 = arith.constant 0.000000e+00 : f32
    %145 = vector.broadcast %cst_31 : f32 to vector<32x128xf32>
    %146 = arith.subf %145, %144 : vector<32x128xf32>
    %147 = math.exp %146 : vector<32x128xf32>
    %148 = math.log1p %147 : vector<32x128xf32>
    %149 = arith.addf %143, %148 : vector<32x128xf32>
    %150 = arith.mulf %25, %149 : vector<32x128xf32>
    %cst_32 = arith.constant dense<0.000000e+00> : vector<128xf32>
    %151 = vector.multi_reduction <add>, %150, %cst_32 [0] : vector<32x128xf32> to vector<128xf32>
    %152 = vector.shape_cast %151 : vector<128xf32> to vector<1x128xf32>
    %153 = arith.addf %152, %39 : vector<1x128xf32>
    %154 = arith.mulf %153, %50 : vector<1x128xf32>
    %155 = arith.addf %117, %154 : vector<1x128xf32>
    %156 = arith.mulf %29, %149 : vector<32x128xf32>
    %cst_33 = arith.constant dense<0.000000e+00> : vector<128xf32>
    %157 = vector.multi_reduction <add>, %156, %cst_33 [0] : vector<32x128xf32> to vector<128xf32>
    %158 = vector.shape_cast %157 : vector<128xf32> to vector<1x128xf32>
    %159 = arith.addf %158, %42 : vector<1x128xf32>
    %160 = arith.mulf %159, %50 : vector<1x128xf32>
    %161 = arith.addf %123, %160 : vector<1x128xf32>
    %162 = arith.mulf %33, %149 : vector<32x128xf32>
    %cst_34 = arith.constant dense<0.000000e+00> : vector<128xf32>
    %163 = vector.multi_reduction <add>, %162, %cst_34 [0] : vector<32x128xf32> to vector<128xf32>
    %164 = vector.shape_cast %163 : vector<128xf32> to vector<1x128xf32>
    %165 = arith.addf %164, %45 : vector<1x128xf32>
    %166 = arith.mulf %165, %50 : vector<1x128xf32>
    %167 = arith.addf %129, %166 : vector<1x128xf32>
    %168 = vector.broadcast %155 : vector<1x128xf32> to vector<32x128xf32>
    %169 = arith.mulf %13, %168 : vector<32x128xf32>
    %170 = arith.addf %36, %169 : vector<32x128xf32>
    %171 = vector.broadcast %161 : vector<1x128xf32> to vector<32x128xf32>
    %172 = arith.mulf %17, %171 : vector<32x128xf32>
    %173 = arith.addf %170, %172 : vector<32x128xf32>
    %174 = vector.broadcast %167 : vector<1x128xf32> to vector<32x128xf32>
    %175 = arith.mulf %21, %174 : vector<32x128xf32>
    %176 = arith.addf %173, %175 : vector<32x128xf32>
    %177 = math.tanh %176 : vector<32x128xf32>
    %cst_35 = arith.constant dense<0.000000e+00> : vector<32x128xf32>
    %178 = tpu.matmul %3, %177, %cst_35 {dimension_numbers = #tpu.dot_dimension_numbers<[1], [0], [0], [1], [0, 0, 1, 1], [], []>} : vector<32x32xf32>, vector<32x128xf32>, vector<32x128xf32> -> vector<32x128xf32>
    %179 = arith.addf %178, %7 : vector<32x128xf32>
    %cst_36 = arith.constant 0.000000e+00 : f32
    %180 = vector.broadcast %cst_36 : f32 to vector<32x128xf32>
    %181 = arith.maximumf %179, %180 : vector<32x128xf32>
    %182 = math.absf %179 : vector<32x128xf32>
    %cst_37 = arith.constant 0.000000e+00 : f32
    %183 = vector.broadcast %cst_37 : f32 to vector<32x128xf32>
    %184 = arith.subf %183, %182 : vector<32x128xf32>
    %185 = math.exp %184 : vector<32x128xf32>
    %186 = math.log1p %185 : vector<32x128xf32>
    %187 = arith.addf %181, %186 : vector<32x128xf32>
    %188 = arith.mulf %25, %187 : vector<32x128xf32>
    %cst_38 = arith.constant dense<0.000000e+00> : vector<128xf32>
    %189 = vector.multi_reduction <add>, %188, %cst_38 [0] : vector<32x128xf32> to vector<128xf32>
    %190 = vector.shape_cast %189 : vector<128xf32> to vector<1x128xf32>
    %191 = arith.addf %190, %39 : vector<1x128xf32>
    %192 = arith.mulf %191, %50 : vector<1x128xf32>
    %193 = arith.addf %155, %192 : vector<1x128xf32>
    %194 = arith.mulf %29, %187 : vector<32x128xf32>
    %cst_39 = arith.constant dense<0.000000e+00> : vector<128xf32>
    %195 = vector.multi_reduction <add>, %194, %cst_39 [0] : vector<32x128xf32> to vector<128xf32>
    %196 = vector.shape_cast %195 : vector<128xf32> to vector<1x128xf32>
    %197 = arith.addf %196, %42 : vector<1x128xf32>
    %198 = arith.mulf %197, %50 : vector<1x128xf32>
    %199 = arith.addf %161, %198 : vector<1x128xf32>
    %200 = arith.mulf %33, %187 : vector<32x128xf32>
    %cst_40 = arith.constant dense<0.000000e+00> : vector<128xf32>
    %201 = vector.multi_reduction <add>, %200, %cst_40 [0] : vector<32x128xf32> to vector<128xf32>
    %202 = vector.shape_cast %201 : vector<128xf32> to vector<1x128xf32>
    %203 = arith.addf %202, %45 : vector<1x128xf32>
    %204 = arith.mulf %203, %50 : vector<1x128xf32>
    %205 = arith.addf %167, %204 : vector<1x128xf32>
    %206 = vector.broadcast %193 : vector<1x128xf32> to vector<32x128xf32>
    %207 = arith.mulf %13, %206 : vector<32x128xf32>
    %208 = arith.addf %36, %207 : vector<32x128xf32>
    %209 = vector.broadcast %199 : vector<1x128xf32> to vector<32x128xf32>
    %210 = arith.mulf %17, %209 : vector<32x128xf32>
    %211 = arith.addf %208, %210 : vector<32x128xf32>
    %212 = vector.broadcast %205 : vector<1x128xf32> to vector<32x128xf32>
    %213 = arith.mulf %21, %212 : vector<32x128xf32>
    %214 = arith.addf %211, %213 : vector<32x128xf32>
    %215 = math.tanh %214 : vector<32x128xf32>
    %cst_41 = arith.constant dense<0.000000e+00> : vector<32x128xf32>
    %216 = tpu.matmul %3, %215, %cst_41 {dimension_numbers = #tpu.dot_dimension_numbers<[1], [0], [0], [1], [0, 0, 1, 1], [], []>} : vector<32x32xf32>, vector<32x128xf32>, vector<32x128xf32> -> vector<32x128xf32>
    %217 = arith.addf %216, %7 : vector<32x128xf32>
    %cst_42 = arith.constant 0.000000e+00 : f32
    %218 = vector.broadcast %cst_42 : f32 to vector<32x128xf32>
    %219 = arith.maximumf %217, %218 : vector<32x128xf32>
    %220 = math.absf %217 : vector<32x128xf32>
    %cst_43 = arith.constant 0.000000e+00 : f32
    %221 = vector.broadcast %cst_43 : f32 to vector<32x128xf32>
    %222 = arith.subf %221, %220 : vector<32x128xf32>
    %223 = math.exp %222 : vector<32x128xf32>
    %224 = math.log1p %223 : vector<32x128xf32>
    %225 = arith.addf %219, %224 : vector<32x128xf32>
    %226 = arith.mulf %25, %225 : vector<32x128xf32>
    %cst_44 = arith.constant dense<0.000000e+00> : vector<128xf32>
    %227 = vector.multi_reduction <add>, %226, %cst_44 [0] : vector<32x128xf32> to vector<128xf32>
    %228 = vector.shape_cast %227 : vector<128xf32> to vector<1x128xf32>
    %229 = arith.addf %228, %39 : vector<1x128xf32>
    %230 = arith.mulf %229, %50 : vector<1x128xf32>
    %231 = arith.addf %193, %230 : vector<1x128xf32>
    %232 = arith.mulf %29, %225 : vector<32x128xf32>
    %cst_45 = arith.constant dense<0.000000e+00> : vector<128xf32>
    %233 = vector.multi_reduction <add>, %232, %cst_45 [0] : vector<32x128xf32> to vector<128xf32>
    %234 = vector.shape_cast %233 : vector<128xf32> to vector<1x128xf32>
    %235 = arith.addf %234, %42 : vector<1x128xf32>
    %236 = arith.mulf %235, %50 : vector<1x128xf32>
    %237 = arith.addf %199, %236 : vector<1x128xf32>
    %238 = arith.mulf %33, %225 : vector<32x128xf32>
    %cst_46 = arith.constant dense<0.000000e+00> : vector<128xf32>
    %239 = vector.multi_reduction <add>, %238, %cst_46 [0] : vector<32x128xf32> to vector<128xf32>
    %240 = vector.shape_cast %239 : vector<128xf32> to vector<1x128xf32>
    %241 = arith.addf %240, %45 : vector<1x128xf32>
    %242 = arith.mulf %241, %50 : vector<1x128xf32>
    %243 = arith.addf %205, %242 : vector<1x128xf32>
    %244 = vector.broadcast %231 : vector<1x128xf32> to vector<32x128xf32>
    %245 = arith.mulf %13, %244 : vector<32x128xf32>
    %246 = arith.addf %36, %245 : vector<32x128xf32>
    %247 = vector.broadcast %237 : vector<1x128xf32> to vector<32x128xf32>
    %248 = arith.mulf %17, %247 : vector<32x128xf32>
    %249 = arith.addf %246, %248 : vector<32x128xf32>
    %250 = vector.broadcast %243 : vector<1x128xf32> to vector<32x128xf32>
    %251 = arith.mulf %21, %250 : vector<32x128xf32>
    %252 = arith.addf %249, %251 : vector<32x128xf32>
    %253 = math.tanh %252 : vector<32x128xf32>
    %cst_47 = arith.constant dense<0.000000e+00> : vector<32x128xf32>
    %254 = tpu.matmul %3, %253, %cst_47 {dimension_numbers = #tpu.dot_dimension_numbers<[1], [0], [0], [1], [0, 0, 1, 1], [], []>} : vector<32x32xf32>, vector<32x128xf32>, vector<32x128xf32> -> vector<32x128xf32>
    %255 = arith.addf %254, %7 : vector<32x128xf32>
    %cst_48 = arith.constant 0.000000e+00 : f32
    %256 = vector.broadcast %cst_48 : f32 to vector<32x128xf32>
    %257 = arith.maximumf %255, %256 : vector<32x128xf32>
    %258 = math.absf %255 : vector<32x128xf32>
    %cst_49 = arith.constant 0.000000e+00 : f32
    %259 = vector.broadcast %cst_49 : f32 to vector<32x128xf32>
    %260 = arith.subf %259, %258 : vector<32x128xf32>
    %261 = math.exp %260 : vector<32x128xf32>
    %262 = math.log1p %261 : vector<32x128xf32>
    %263 = arith.addf %257, %262 : vector<32x128xf32>
    %264 = arith.mulf %25, %263 : vector<32x128xf32>
    %cst_50 = arith.constant dense<0.000000e+00> : vector<128xf32>
    %265 = vector.multi_reduction <add>, %264, %cst_50 [0] : vector<32x128xf32> to vector<128xf32>
    %266 = vector.shape_cast %265 : vector<128xf32> to vector<1x128xf32>
    %267 = arith.addf %266, %39 : vector<1x128xf32>
    %268 = arith.mulf %267, %50 : vector<1x128xf32>
    %269 = arith.addf %231, %268 : vector<1x128xf32>
    %270 = arith.mulf %29, %263 : vector<32x128xf32>
    %cst_51 = arith.constant dense<0.000000e+00> : vector<128xf32>
    %271 = vector.multi_reduction <add>, %270, %cst_51 [0] : vector<32x128xf32> to vector<128xf32>
    %272 = vector.shape_cast %271 : vector<128xf32> to vector<1x128xf32>
    %273 = arith.addf %272, %42 : vector<1x128xf32>
    %274 = arith.mulf %273, %50 : vector<1x128xf32>
    %275 = arith.addf %237, %274 : vector<1x128xf32>
    %276 = arith.mulf %33, %263 : vector<32x128xf32>
    %cst_52 = arith.constant dense<0.000000e+00> : vector<128xf32>
    %277 = vector.multi_reduction <add>, %276, %cst_52 [0] : vector<32x128xf32> to vector<128xf32>
    %278 = vector.shape_cast %277 : vector<128xf32> to vector<1x128xf32>
    %279 = arith.addf %278, %45 : vector<1x128xf32>
    %280 = arith.mulf %279, %50 : vector<1x128xf32>
    %281 = arith.addf %243, %280 : vector<1x128xf32>
    %282 = vector.broadcast %269 : vector<1x128xf32> to vector<32x128xf32>
    %283 = arith.mulf %13, %282 : vector<32x128xf32>
    %284 = arith.addf %36, %283 : vector<32x128xf32>
    %285 = vector.broadcast %275 : vector<1x128xf32> to vector<32x128xf32>
    %286 = arith.mulf %17, %285 : vector<32x128xf32>
    %287 = arith.addf %284, %286 : vector<32x128xf32>
    %288 = vector.broadcast %281 : vector<1x128xf32> to vector<32x128xf32>
    %289 = arith.mulf %21, %288 : vector<32x128xf32>
    %290 = arith.addf %287, %289 : vector<32x128xf32>
    %291 = math.tanh %290 : vector<32x128xf32>
    %cst_53 = arith.constant dense<0.000000e+00> : vector<32x128xf32>
    %292 = tpu.matmul %3, %291, %cst_53 {dimension_numbers = #tpu.dot_dimension_numbers<[1], [0], [0], [1], [0, 0, 1, 1], [], []>} : vector<32x32xf32>, vector<32x128xf32>, vector<32x128xf32> -> vector<32x128xf32>
    %293 = arith.addf %292, %7 : vector<32x128xf32>
    %cst_54 = arith.constant 0.000000e+00 : f32
    %294 = vector.broadcast %cst_54 : f32 to vector<32x128xf32>
    %295 = arith.maximumf %293, %294 : vector<32x128xf32>
    %296 = math.absf %293 : vector<32x128xf32>
    %cst_55 = arith.constant 0.000000e+00 : f32
    %297 = vector.broadcast %cst_55 : f32 to vector<32x128xf32>
    %298 = arith.subf %297, %296 : vector<32x128xf32>
    %299 = math.exp %298 : vector<32x128xf32>
    %300 = math.log1p %299 : vector<32x128xf32>
    %301 = arith.addf %295, %300 : vector<32x128xf32>
    %302 = arith.mulf %25, %301 : vector<32x128xf32>
    %cst_56 = arith.constant dense<0.000000e+00> : vector<128xf32>
    %303 = vector.multi_reduction <add>, %302, %cst_56 [0] : vector<32x128xf32> to vector<128xf32>
    %304 = vector.shape_cast %303 : vector<128xf32> to vector<1x128xf32>
    %305 = arith.addf %304, %39 : vector<1x128xf32>
    %306 = arith.mulf %305, %50 : vector<1x128xf32>
    %307 = arith.addf %269, %306 : vector<1x128xf32>
    %308 = arith.mulf %29, %301 : vector<32x128xf32>
    %cst_57 = arith.constant dense<0.000000e+00> : vector<128xf32>
    %309 = vector.multi_reduction <add>, %308, %cst_57 [0] : vector<32x128xf32> to vector<128xf32>
    %310 = vector.shape_cast %309 : vector<128xf32> to vector<1x128xf32>
    %311 = arith.addf %310, %42 : vector<1x128xf32>
    %312 = arith.mulf %311, %50 : vector<1x128xf32>
    %313 = arith.addf %275, %312 : vector<1x128xf32>
    %314 = arith.mulf %33, %301 : vector<32x128xf32>
    %cst_58 = arith.constant dense<0.000000e+00> : vector<128xf32>
    %315 = vector.multi_reduction <add>, %314, %cst_58 [0] : vector<32x128xf32> to vector<128xf32>
    %316 = vector.shape_cast %315 : vector<128xf32> to vector<1x128xf32>
    %317 = arith.addf %316, %45 : vector<1x128xf32>
    %318 = arith.mulf %317, %50 : vector<1x128xf32>
    %319 = arith.addf %281, %318 : vector<1x128xf32>
    %c0_59 = arith.constant 0 : index
    %c0_60 = arith.constant 0 : index
    %320 = vector.load %arg9[%c0_59, %c0_60] : memref<3x128xf32, #tpu.memory_space<vmem>>, vector<1x128xf32>
    tpu.vector_store %arg9[%c0_59, %c0_60], %307 {strides = array<i32>} : memref<3x128xf32, #tpu.memory_space<vmem>>, vector<1x128xf32>,
    %c1_61 = arith.constant 1 : index
    %c0_62 = arith.constant 0 : index
    %321 = vector.load %arg9[%c1_61, %c0_62] : memref<3x128xf32, #tpu.memory_space<vmem>>, vector<1x128xf32>
    tpu.vector_store %arg9[%c1_61, %c0_62], %313 {strides = array<i32>} : memref<3x128xf32, #tpu.memory_space<vmem>>, vector<1x128xf32>,
    %c2_63 = arith.constant 2 : index
    %c0_64 = arith.constant 0 : index
    %322 = vector.load %arg9[%c2_63, %c0_64] : memref<3x128xf32, #tpu.memory_space<vmem>>, vector<1x128xf32>
    tpu.vector_store %arg9[%c2_63, %c0_64], %319 {strides = array<i32>} : memref<3x128xf32, #tpu.memory_space<vmem>>, vector<1x128xf32>,
    return
  }
  func.func @transform_0(%arg0: i32) -> i32 {
    %c0_i32 = arith.constant 0 : i32
    %c0_i32_0 = arith.constant 0 : i32
    return %c0_i32 : i32
  }
  func.func @transform_1(%arg0: i32) -> (i32, i32) {
    %c0_i32 = arith.constant 0 : i32
    %c0_i32_0 = arith.constant 0 : i32
    return %c0_i32, %arg0 : i32, i32
  }
  func.func @transform_2(%arg0: i32) -> (i32, i32) {
    %c0_i32 = arith.constant 0 : i32
    %c0_i32_0 = arith.constant 0 : i32
    %c0_i32_1 = arith.constant 0 : i32
    return %c0_i32, %c0_i32_0 : i32, i32
  }
  func.func @transform_3(%arg0: i32) -> (i32, i32) {
    %c0_i32 = arith.constant 0 : i32
    %c0_i32_0 = arith.constant 0 : i32
    %c0_i32_1 = arith.constant 0 : i32
    return %c0_i32, %c0_i32_0 : i32, i32
  }
  func.func @transform_4(%arg0: i32) -> (i32, i32) {
    %c0_i32 = arith.constant 0 : i32
    %c0_i32_0 = arith.constant 0 : i32
    %c0_i32_1 = arith.constant 0 : i32
    return %c0_i32, %c0_i32_0 : i32, i32
  }
  func.func @transform_5(%arg0: i32) -> (i32, i32) {
    %c0_i32 = arith.constant 0 : i32
    %c0_i32_0 = arith.constant 0 : i32
    %c0_i32_1 = arith.constant 0 : i32
    return %c0_i32, %c0_i32_0 : i32, i32
  }
  func.func @transform_6(%arg0: i32) -> (i32, i32) {
    %c0_i32 = arith.constant 0 : i32
    %c0_i32_0 = arith.constant 0 : i32
    %c0_i32_1 = arith.constant 0 : i32
    return %c0_i32, %c0_i32_0 : i32, i32
  }
  func.func @transform_7(%arg0: i32) -> (i32, i32) {
    %c0_i32 = arith.constant 0 : i32
    %c0_i32_0 = arith.constant 0 : i32
    %c0_i32_1 = arith.constant 0 : i32
    return %c0_i32, %c0_i32_0 : i32, i32
  }
  func.func @transform_8(%arg0: i32) -> (i32, i32) {
    %c0_i32 = arith.constant 0 : i32
    %c0_i32_0 = arith.constant 0 : i32
    return %c0_i32, %arg0 : i32, i32
  }
}

</mosaic_0001>

<bundles_post_ra>
// kernel: tpu_custom_call.1
= control target key start
LH: loop header
LB: loop body
LE: loop exit
PB: predicated region body
PF: predicated region fallthrough
CT: control target
= control target key end

     0   :  { %13 = vsyncpa [#allocation4], 0  ;;  %s2464_s0 = inlined_call_operand.vmem [shape: f32[8], index: 0, kind: input, shape index: {}]   ;;  %s2465_s1 = inlined_call_operand.vmem [shape: f32[3,128], index: 1, kind: input, shape index: {}]   ;;  %s2466_s2 = inlined_call_operand.vmem [shape: f32[32,3], index: 2, kind: input, shape index: {}]   ;;  %s2467_s3 = inlined_call_operand.vmem [shape: f32[32,1], index: 3, kind: input, shape index: {}]   ;;  %s2468_s4 = inlined_call_operand.vmem [shape: f32[32,32], index: 4, kind: input, shape index: {}]   ;;  %s2469_s5 = inlined_call_operand.vmem [shape: f32[32,1], index: 5, kind: input, shape index: {}]   ;;  %s2470_s6 = inlined_call_operand.vmem [shape: f32[32,3], index: 6, kind: input, shape index: {}]   ;;  %s2471_s7 = inlined_call_operand.vmem [shape: f32[3,1], index: 7, kind: input, shape index: {}]   ;;  %s2472_s8 = inlined_call_operand.hbm [shape: f32[3,128], index: 8, kind: output, shape index: {}]  }
   0x1   :  { %14 = vsyncpa [#allocation3], 0  ;;  %s20_s29 = sshll.u32 %s2464_s0, 4  ;;  %s1752_s30 = smov [#allocation2]   ;;  %s21_s29 = int_to_ptr.vmem [resolvable:$true] %s20_s29 }
   0x2   :  { %23 = dma.vmem_to_smem %s21_s29, 16, %s1752_s30, [#allocation4]  }
   0x3   :  { %1748 = dma.done.wait [#allocation4], 16  }
   0x4   :  { %1749 = vsyncadd [#allocation4], 4294967280 }
   0x5   :  { %42 = sfence }
   0x6   :  { %v46_v0 = vld [vmem:[%s2466_s2 + $0x18] sm:$0xff]  ;;  %v1753_v1 = vmov 2   ;;  %v1754_v2 = vmov 1   ;;  %v44_v3 = vld [vmem:[%s2466_s2 + $0x8] sm:$0xff]  ;;  %v1755_v4 = vmov 0   ;;  %v45_v6 = vld [vmem:[%s2466_s2 + $0x10] sm:$0xff] }
   0x7   :  { %1521 = vset.pattern.permute.xlu0 %v1753_v1  ;;  %1517 = vset.pattern.permute.xlu1 %v1754_v2  ;;  %v50_v5 = vld [vmem:[%s2467_s3 + $0x18] sm:$0xff]  ;;  %v49_v7 = vld [vmem:[%s2467_s3 + $0x10] sm:$0xff]  ;;  %v43_v8 = vld [vmem:[%s2466_s2] sm:$0xff]  ;;  %vm251_vm0 = vcmask 261120   ;;  %s1471_s27 = sld [smem:[#allocation2 + $0x1]]  ;;  %s1461_s21 = sshll.u32 %s2472_s8, 4  ;;  %s1462_s21 = int_to_ptr.hbm [resolvable:$true] %s1461_s21 }
   0x8   :  { %133 = vperm.xlu0 %1521, %v46_v0   ;;  %117 = vperm.xlu1 %1517, %v46_v0   ;;  %v48_v9 = vld [vmem:[%s2467_s3 + $0x8] sm:$0xff]  ;;  %v55_v10 = vld [vmem:[%s2469_s5] sm:$0xff]  ;;  %v58_v11 = vld [vmem:[%s2469_s5 + $0x18] sm:$0xff]  ;;  %s214_s28 = sld [smem:[#allocation2]] }
   0x9   :  { %1519 = vset.pattern.permute.xlu2 %v1755_v4  ;;  %v47_v12 = vld [vmem:[%s2467_s3] sm:$0xff]  ;;  %v56_v13 = vld [vmem:[%s2469_s5 + $0x8] sm:$0xff]  ;;  %v57_v55 = vld [vmem:[%s2469_s5 + $0x10] sm:$0xff] }
   0xa   :  { %91 = vperm.xlu2 %1519, %v44_v3   ;;  %v1851_v14 = vld [vmem:[%s2470_s6] sm:$0xff]  ;;  %v80_v54 = vld [vmem:[%s2470_s6 + $0x8] sm:$0xff]  ;;  %v81_v63 = vld [vmem:[%s2470_s6 + $0x10] sm:$0xff] }
   0xb   :  { %v1537_v20 = vld [vmem:[%s2465_s1] ss:$0 sm:$0xff]  ;;  %v1538_v21 = vld [vmem:[%s2465_s1 + $0x1] ss:$0 sm:$0xff]  ;;  %v1539_v22 = vld [vmem:[%s2465_s1 + $0x2] ss:$0 sm:$0xff] }
   0xe   :  { %s215_s29 = ssub.f32 %s1471_s27, %s214_s28 }
  0x10   :  { %1522 = vset.pattern.permute.xlu0 %v1755_v4  ;;  %1518 = vset.pattern.permute.xlu1 %v1755_v4 }
  0x11   :  { %101 = vperm.xlu0 %1522, %v46_v0   ;;  %205 = vperm.xlu1 %1518, %v50_v5   ;;  %v83_v0 = vld [vmem:[%s2471_s7] sm:$0x7]  ;;  %v1937_v5 = vld [vmem:[%s2468_s4 + $0x8] sm:$0xff] }
  0x12   :  { %1520 = vset.pattern.permute.xlu2 %v1754_v2  ;;  %2496 = vst [vmem:[#allocation10_spill] sm:$0xff] %v1937_v5 }
  0x13   :  { %113 = vperm.xlu2 %1520, %v45_v6  }
  0x19   :  { %200 = vperm.xlu1 %1518, %v49_v7   ;;  %96 = vperm.xlu0 %1522, %v45_v6   ;;  %v82_v7 = vld [vmem:[%s2470_s6 + $0x18] sm:$0xff] }
  0x1b   :  { %1523 = vset.pattern.permute.xlu2 %v1755_v4 }
  0x1c   :  { %86 = vperm.xlu2 %1523, %v43_v8  }
  0x21   :  { %1524 = vset.pattern.permute.xlu1 %v1754_v2  ;;  %195 = vperm.xlu0 %1522, %v48_v9  }
  0x22   :  { %109 = vperm.xlu1 %1524, %v44_v3  }
  0x24   :  { %1525 = vset.pattern.permute.xlu2 %v1753_v1 }
  0x25   :  { %129 = vperm.xlu2 %1525, %v45_v6  }
  0x29   :  { %61 = vperm.xlu0 %1522, %v55_v10  }
  0x2a   :  { %105 = vperm.xlu1 %1524, %v43_v8  }
  0x2d   :  { %125 = vperm.xlu2 %1525, %v44_v3   ;;  %v1932_v3 = vld [vmem:[%s2468_s4] sm:$0xff] }
  0x2e   :  { %2495 = vst [vmem:[#allocation9_spill] sm:$0xff] %v1932_v3 }
  0x31   :  { %76 = vperm.xlu0 %1522, %v58_v11  }
  0x32   :  { %1526 = vset.pattern.permute.xlu1 %v1755_v4 }
  0x33   :  { %190 = vperm.xlu1 %1526, %v47_v12  }
  0x35   :  { %121 = vperm.xlu2 %1525, %v43_v8   ;;  %v1950_v8 = vld [vmem:[%s2468_s4 + $0x10] sm:$0xff] }
  0x36   :  { %2497 = vst [vmem:[#allocation11_spill] sm:$0xff] %v1950_v8 }
  0x39   :  { %1528 = vset.pattern.permute.xlu0 %v1754_v2 }
  0x3a   :  { %157 = vperm.xlu0 %1528, %v1851_v14  }
  0x3b   :  { %66 = vperm.xlu1 %1526, %v56_v13  }
  0x3d   :  { %1527 = vset.pattern.permute.xlu2 %v1755_v4 }
  0x3e   :  { %71 = vperm.xlu2 %1527, %v57_v55  }
  0x42   :  { %1531 = vset.pattern.permute.xlu0 %v1753_v1 }
  0x43   :  { %138 = vperm.xlu1 %1526, %v1851_v14   ;;  %177 = vperm.xlu0 %1531, %v80_v54  }
  0x46   :  { %143 = vperm.xlu2 %1527, %v80_v54  }
  0x4b   :  { %1529 = vset.pattern.permute.xlu1 %v1754_v2  ;;  %1536 = vset.pattern.permute.xlu0 %v1755_v4 }
  0x4c   :  { %161 = vperm.xlu1 %1529, %v80_v54   ;;  %210 = vperm.xlu0 %1536, %v83_v0  }
  0x4e   :  { %148 = vperm.xlu2 %1527, %v81_v63  }
  0x54   :  { %165 = vperm.xlu1 %1529, %v81_v63  }
  0x56   :  { %1530 = vset.pattern.permute.xlu2 %v1753_v1 }
  0x57   :  { %173 = vperm.xlu2 %1530, %v1851_v14  }
  0x5c   :  { %1532 = vset.pattern.permute.xlu1 %v1755_v4  ;;  %v1960_v4 = vld [vmem:[%s2468_s4 + $0x18] sm:$0xff] }
  0x5d   :  { %153 = vperm.xlu1 %1532, %v82_v7   ;;  %2498 = vst [vmem:[#allocation12_spill] sm:$0xff] %v1960_v4 }
  0x5f   :  { %1533 = vset.pattern.permute.xlu2 %v1754_v2 }
  0x60   :  { %169 = vperm.xlu2 %1533, %v82_v7  }
  0x64   :  { %v1859_v15 = vpop.permute.xlu2 %91 }
  0x65   :  { %v222_v41 = vmul.f32 %v1537_v20, %v1859_v15  ;;  %1534 = vset.pattern.permute.xlu1 %v1753_v1 }
  0x66   :  { %181 = vperm.xlu1 %1534, %v81_v63  }
  0x68   :  { %1535 = vset.pattern.permute.xlu2 %v1753_v1 }
  0x69   :  { %185 = vperm.xlu2 %1535, %v82_v7  }
  0x6d   :  { %v1861_v16 = vpop.permute.xlu2 %113 }
  0x6e   :  { %v232_v36 = vmul.f32 %v1538_v21, %v1861_v16 }
  0x76   :  { %v1867_v19 = vpop.permute.xlu2 %86 }
  0x77   :  { %v221_v53 = vmul.f32 %v1537_v20, %v1867_v19 }
  0x7a   :  { %v1863_v17 = vpop.permute.xlu1 %117  ;;  %v1865_v18 = vpop.permute.xlu0 %133 }
  0x7b   :  { %v233_v27 = vmul.f32 %v1538_v21, %v1863_v17  ;;  %v242_v28 = vmul.f32 %v1539_v22, %v1865_v18 }
  0x7f   :  { %v1886_v30 = vpop.permute.xlu2 %129 }
  0x80   :  { %v241_v37 = vmul.f32 %v1539_v22, %v1886_v30 }
  0x83   :  { %v1878_v23 = vpop.permute.xlu0 %101  ;;  %v1880_v24 = vpop.permute.xlu1 %205 }
  0x84   :  { %v224_v25 = vmul.f32 %v1537_v20, %v1878_v23 }
  0x86   :  { %v228_v26 = vadd.f32 %v224_v25, %v1880_v24 }
  0x87   :  { %v1899_v43 = vpop.permute.xlu2 %125 }
  0x88   :  { %v237_v29 = vadd.f32 %v233_v27, %v228_v26  ;;  %v240_v47 = vmul.f32 %v1539_v22, %v1899_v43 }
  0x8a   :  { %v246_v31 = vadd.f32 %v242_v28, %v237_v29 }
  0x8b   :  { %v1888_v32 = vpop.permute.xlu1 %200  ;;  %v1890_v33 = vpop.permute.xlu0 %96 }
  0x8c   :  { %1540 = vtanh.f32 %v246_v31  ;;  %v223_v34 = vmul.f32 %v1537_v20, %v1890_v33 }
  0x8e   :  { %v227_v35 = vadd.f32 %v223_v34, %v1888_v32 }
  0x8f   :  { %v1915_v56 = vpop.permute.xlu2 %121 }
  0x90   :  { %v236_v38 = vadd.f32 %v232_v36, %v227_v35  ;;  %2494 = vst [vmem:[#allocation8_spill] sm:$0xff] %v1915_v56  ;;  %v239_v61 = vmul.f32 %v1539_v22, %v1915_v56 }
  0x92   :  { %v1541_v39 = vpop.eup %1540  ;;  %v245_v40 = vadd.f32 %v241_v37, %v236_v38 }
  0x93   :  { %276 = vmatpush.msra.mxu0 %v1541_v39  ;;  %1500 = vmatpush.msra.mxu3 %v1541_v39  ;;  %v1897_v42 = vpop.permute.xlu0 %195 }
  0x94   :  { %v1901_v44 = vpop.permute.xlu1 %109  ;;  %1542 = vtanh.f32 %v245_v40  ;;  %v226_v45 = vadd.f32 %v222_v41, %v1897_v42 }
  0x95   :  { %v231_v46 = vmul.f32 %v1538_v21, %v1901_v44 }
  0x97   :  { %v235_v48 = vadd.f32 %v231_v46, %v226_v45 }
  0x98   :  { %v1973_v13 = vpop.permute.xlu2 %71 }
  0x99   :  { %v244_v49 = vadd.f32 %v240_v47, %v235_v48  ;;  %2501 = vst [vmem:[#allocation15_spill] sm:$0xff] %v1973_v13 }
  0x9a   :  { %v1543_v50 = vpop.eup %1542 }
  0x9b   :  { %277 = vmatpush.msra.mxu0 %v1543_v50  ;;  %1501 = vmatpush.msra.mxu3 %v1543_v50  ;;  %1544 = vtanh.f32 %v244_v49  ;;  %v1968_v10 = vpop.permute.xlu0 %61 }
  0x9c   :  { %v1906_v51 = vpop.permute.xlu1 %105  ;;  %2500 = vst [vmem:[#allocation14_spill] sm:$0xff] %v1968_v10 }
  0x9d   :  { %v230_v59 = vmul.f32 %v1538_v21, %v1906_v51 }
  0xa0   :  { %v1982_v27 = vpop.permute.xlu2 %143 }
  0xa1   :  { %v1545_v52 = vpop.eup %1544 }
  0xa2   :  { %278 = vmatpush.msra.mxu0 %v1545_v52  ;;  %1502 = vmatpush.msra.mxu3 %v1545_v52 }
  0xa3   :  { %v1990_v40 = vpop.permute.xlu0 %76 }
  0xa4   :  { %2502 = vst [vmem:[#allocation16_spill] sm:$0xff] %v1990_v40 }
  0xa5   :  { %v1917_v57 = vpop.permute.xlu1 %190 }
  0xa6   :  { %v225_v58 = vadd.f32 %v221_v53, %v1917_v57 }
  0xa8   :  { %v234_v60 = vadd.f32 %v230_v59, %v225_v58  ;;  %v1992_v47 = vpop.permute.xlu2 %148 }
  0xaa   :  { %v243_v62 = vadd.f32 %v239_v61, %v234_v60 }
  0xac   :  { %1546 = vtanh.f32 %v243_v62 }
  0xad   :  { %v1966_v9 = vpop.permute.xlu1 %66 }
  0xae   :  { %2499 = vst [vmem:[#allocation13_spill] sm:$0xff] %v1966_v9 }
  0xb1   :  { %v2000_v62 = vpop.permute.xlu2 %173 }
  0xb2   :  { %v1547_v6 = vpop.eup %1546 }
  0xb3   :  { %279 = vmatpush.msra.mxu0 %v1547_v6  ;;  %1503 = vmatpush.msra.mxu3 %v1547_v6  ;;  %v2002_v6 = vpop.permute.xlu0 %157 }
  0xb4   :  { %1472 = vmatmul.msk.f32.vlgmr.msra.gmra.mxu0 %vm251_vm0, %v1932_v3  ;;  %1473 = vmatmul.msk.f32.vlgmr.msra.gmra.mxu3 %vm251_vm0, %v1937_v5 }
  0xb5   :  { %v1979_v22 = vpop.permute.xlu1 %138 }
  0xbc   :  { %1474 = vmatmul.msk.f32.gmra.mxu3 %vm251_vm0, %v1950_v8 }
  0xbe   :  { %v1987_v34 = vpop.permute.xlu1 %161 }
  0xc4   :  { %1475 = vmatmul.msk.f32.gmra.mxu3 %vm251_vm0, %v1960_v4 }
  0xc6   :  { %v1998_v50 = vpop.permute.xlu1 %165 }
 0x131   :  { %v281_v11 = vpop.f32.mrf.mxu0 }
 0x132   :  { %v1971_v12 = vadd.f32 %v281_v11, %v1968_v10 }
 0x134   :  { %v297_v14 = vand.u32 2147483647, %v1971_v12 }
 0x136   :  { %v301_v20 = vsub.f32 0.0, %v297_v14 }
 0x137   :  { %v284_v21 = vpop.f32.mrf.mxu3 }
 0x138   :  { %v1977_v2 = vadd.f32 %v284_v21, %v1966_v9  ;;  %v305_v1 = vmul.f32 1.442695, %v301_v20  ;;  %v2004_v21 = vpop.permute.xlu1 %153 }
 0x13a   :  { %v298_v25 = vand.u32 2147483647, %v1977_v2  ;;  %1548 = vpow2.f32 %v305_v1 }
 0x13c   :  { %v302_v26 = vsub.f32 0.0, %v298_v25 }
 0x13e   :  { %v307_v28 = vmul.f32 1.442695, %v302_v26 }
 0x13f   :  { %v287_v29 = vpop.f32.mrf.mxu3 }
 0x140   :  { %1550 = vpow2.f32 %v307_v28  ;;  %v1985_v31 = vadd.f32 %v287_v29, %v1973_v13  ;;  %v1549_v36 = vpop.eup %1548 }
 0x141   :  { %v313_v41 = vadd.f32 1.0, %v1549_v36  ;;  %v316_v55 = vmul.f32 -0.5, %v1549_v36  ;;  %v319_v14 = vand.u32 2147483647, %v1549_v36 }
 0x142   :  { %v299_v35 = vand.u32 2147483647, %v1985_v31 }
 0x143   :  { %v317_v7 = vadd.f32 1.0, %v316_v55  ;;  %vm320_vm2 = vcmp.lt.f32.partialorder %v319_v14, 0.0004427343  ;;  %v2007_v55 = vpop.permute.xlu2 %169 }
 0x144   :  { %v303_v37 = vsub.f32 0.0, %v299_v35 }
 0x145   :  { %v318_v35 = vmul.f32 %v1549_v36, %v317_v7  ;;  %v295_v36 = vmax.f32 %v1985_v31, 0.0  ;;  %v2013_v7 = vpop.permute.xlu1 %181 }
 0x146   :  { %v1551_v38 = vpop.eup %1550  ;;  %v309_v39 = vmul.f32 1.442695, %v303_v37 }
 0x147   :  { %v322_v45 = vadd.f32 1.0, %v1551_v38  ;;  %v290_v46 = vpop.f32.mrf.mxu3  ;;  %v325_v53 = vmul.f32 -0.5, %v1551_v38  ;;  %v328_v11 = vand.u32 2147483647, %v1551_v38 }
 0x148   :  { %1552 = vpow2.f32 %v309_v39  ;;  %v1995_v48 = vadd.f32 %v290_v46, %v1990_v40  ;;  %v294_v39 = vmax.f32 %v1977_v2, 0.0 }
 0x149   :  { %1554 = vlog2.f32 %v322_v45  ;;  %v326_v0 = vadd.f32 1.0, %v325_v53  ;;  %vm329_vm1 = vcmp.lt.f32.partialorder %v328_v11, 0.0004427343 }
 0x14a   :  { %v300_v49 = vand.u32 2147483647, %v1995_v48  ;;  %1556 = vlog2.f32 %v313_v41 }
 0x14b   :  { %v327_v26 = vmul.f32 %v1551_v38, %v326_v0 }
 0x14c   :  { %v304_v52 = vsub.f32 0.0, %v300_v49 }
 0x14e   :  { %v1553_v54 = vpop.eup %1552  ;;  %v311_v58 = vmul.f32 1.442695, %v304_v52 }
 0x14f   :  { %v331_v59 = vadd.f32 1.0, %v1553_v54  ;;  %v1555_v60 = vpop.eup %1554  ;;  %v334_v61 = vmul.f32 -0.5, %v1553_v54  ;;  %v337_v28 = vand.u32 2147483647, %v1553_v54 }
 0x150   :  { %1558 = vpow2.f32 %v311_v58  ;;  %v1557_v63 = vpop.eup %1556  ;;  %v324_v20 = vmul.f32 0.6931472, %v1555_v60  ;;  %v293_v58 = vmax.f32 %v1971_v12, 0.0 }
 0x151   :  { %1560 = vlog2.f32 %v331_v59  ;;  %v315_v1 = vmul.f32 0.6931472, %v1557_v63  ;;  %v335_v25 = vadd.f32 1.0, %v334_v61  ;;  %vm338_vm3 = vcmp.lt.f32.partialorder %v337_v28, 0.0004427343  ;;  %v2011_v61 = vpop.permute.xlu0 %177 }
 0x152   :  { %v330_v41 = vsel %vm329_vm1, %v327_v26, %v324_v20 }
 0x153   :  { %v321_v46 = vsel %vm320_vm2, %v318_v35, %v315_v1  ;;  %v336_v52 = vmul.f32 %v1553_v54, %v335_v25  ;;  %v350_v38 = vadd.f32 %v330_v41, %v294_v39  ;;  %v296_v35 = vmax.f32 %v1995_v48, 0.0 }
 0x154   :  { %v349_v60 = vadd.f32 %v321_v46, %v293_v58 }
 0x155   :  { %v354_v54 = vmul.f32 %v350_v38, %v1982_v27  ;;  %v389_v11 = vmul.f32 %v350_v38, %v2011_v61  ;;  %v370_v20 = vmul.f32 %v350_v38, %v1987_v34 }
 0x156   :  { %v1559_v29 = vpop.eup %1558  ;;  %v353_v12 = vmul.f32 %v349_v60, %v1979_v22  ;;  %v388_v31 = vmul.f32 %v349_v60, %v2000_v62  ;;  %v369_v39 = vmul.f32 %v349_v60, %v2002_v6 }
 0x157   :  { %v1561_v37 = vpop.eup %1560  ;;  %v340_v45 = vadd.f32 1.0, %v1559_v29  ;;  %v343_v53 = vmul.f32 -0.5, %v1559_v29  ;;  %v346_v0 = vand.u32 2147483647, %v1559_v29 }
 0x158   :  { %v333_v49 = vmul.f32 0.6931472, %v1561_v37  ;;  %v357_v41 = vadd.f32 %v354_v54, %v353_v12  ;;  %v392_v46 = vadd.f32 %v389_v11, %v388_v31 }
 0x159   :  { %1562 = vlog2.f32 %v340_v45  ;;  %v344_v63 = vadd.f32 1.0, %v343_v53  ;;  %vm347_vm4 = vcmp.lt.f32.partialorder %v346_v0, 0.0004427343  ;;  %v373_v53 = vadd.f32 %v370_v20, %v369_v39 }
 0x15a   :  { %v339_v59 = vsel %vm338_vm3, %v336_v52, %v333_v49  ;;  %v2025_v49 = vpop.permute.xlu2 %185 }
 0x15b   :  { %v351_v2 = vadd.f32 %v339_v59, %v295_v36  ;;  %v345_v26 = vmul.f32 %v1559_v29, %v344_v63 }
 0x15d   :  { %v355_v1 = vmul.f32 %v351_v2, %v1992_v47  ;;  %v390_v28 = vmul.f32 %v351_v2, %v2013_v7  ;;  %v371_v37 = vmul.f32 %v351_v2, %v1998_v50 }
 0x15f   :  { %v1563_v14 = vpop.eup %1562  ;;  %v358_v58 = vadd.f32 %v357_v41, %v355_v1  ;;  %v393_v38 = vadd.f32 %v392_v46, %v390_v28  ;;  %v374_v36 = vadd.f32 %v373_v53, %v371_v37 }
 0x160   :  { %v342_v25 = vmul.f32 0.6931472, %v1563_v14 }
 0x162   :  { %v348_v45 = vsel %vm347_vm4, %v345_v26, %v342_v25 }
 0x163   :  { %v352_v52 = vadd.f32 %v348_v45, %v296_v35  ;;  %v2030_v45 = vpop.permute.xlu0 %210 }
 0x165   :  { %v356_v29 = vmul.f32 %v352_v52, %v2004_v21  ;;  %v372_v59 = vmul.f32 %v352_v52, %v2007_v55  ;;  %v391_v48 = vmul.f32 %v352_v52, %v2025_v49 }
 0x167   :  { %v359_v63 = vadd.f32 %v358_v58, %v356_v29  ;;  %v375_v2 = vadd.f32 %v374_v36, %v372_v59  ;;  %v394_v0 = vadd.f32 %v393_v38, %v391_v48  ;;  %v2032_v58 = vstv %s215_s29  ;;  %v217_v59 = vld [vmem:[%s2465_s1] sm:$0x1] }
 0x169   :  { %v360_v60 = vrot.slane %v359_v63, 4  ;;  %v376_v54 = vrot.slane %v375_v2, 4  ;;  %v395_v11 = vrot.slane %v394_v0, 4 }
 0x16b   :  { %v361_v14 = vadd.f32 %v360_v60, %v359_v63  ;;  %v377_v12 = vadd.f32 %v376_v54, %v375_v2  ;;  %v396_v20 = vadd.f32 %v395_v11, %v394_v0  ;;  %v218_v0 = vld [vmem:[%s2465_s1 + $0x1] sm:$0x1]  ;;  %v219_v60 = vld [vmem:[%s2465_s1 + $0x2] sm:$0x1] }
 0x16d   :  { %v362_v31 = vrot.slane %v361_v14, 2  ;;  %v378_v1 = vrot.slane %v377_v12, 2  ;;  %v397_v25 = vrot.slane %v396_v20, 2 }
 0x16f   :  { %v363_v26 = vadd.f32 %v362_v31, %v361_v14  ;;  %v379_v28 = vadd.f32 %v378_v1, %v377_v12  ;;  %v398_v35 = vadd.f32 %v397_v25, %v396_v20 }
 0x171   :  { %v364_v37 = vrot.slane %v363_v26, 1  ;;  %v380_v39 = vrot.slane %v379_v28, 1  ;;  %v399_v41 = vrot.slane %v398_v35, 1 }
 0x173   :  { %v365_v46 = vadd.f32 %v364_v37, %v363_v26  ;;  %v381_v52 = vadd.f32 %v380_v39, %v379_v28  ;;  %v400_v53 = vadd.f32 %v399_v41, %v398_v35 }
 0x175   :  { %v366_v38 = vadd.f32 %v365_v46, %v2030_v45  ;;  %v382_v29 = vadd.f32 %v381_v52, %v2030_v45  ;;  %v401_v36 = vadd.f32 %v400_v53, %v2030_v45 }
 0x177   :  { %v367_v48 = vmul.f32 %v366_v38, %v2032_v58  ;;  %v383_v63 = vmul.f32 %v382_v29, %v2032_v58  ;;  %v402_v2 = vmul.f32 %v401_v36, %v2032_v58 }
 0x179   :  { %v2049_v54 = vadd.f32 %v367_v48, %v217_v59  ;;  %v385_v11 = vrot.slane %v383_v63, 1  ;;  %v404_v14 = vrot.slane %v402_v2, 2 }
 0x17b   :  { %v2051_v12 = vadd.f32 %v385_v11, %v218_v0  ;;  %v2053_v20 = vadd.f32 %v404_v14, %v219_v60  ;;  %v407_v31 = vperm.slane %v2049_v54, 0 }
 0x17d   :  { %v411_v1 = vmul.f32 %v407_v31, %v1878_v23  ;;  %v416_v25 = vperm.slane %v2051_v12, 0  ;;  %v425_v26 = vperm.slane %v2053_v20, 0  ;;  %v410_v28 = vmul.f32 %v407_v31, %v1890_v33 }
 0x17e   :  { %v409_v35 = vmul.f32 %v407_v31, %v1859_v15  ;;  %v408_v37 = vmul.f32 %v407_v31, %v1867_v19 }
 0x17f   :  { %v415_v39 = vadd.f32 %v411_v1, %v1880_v24  ;;  %v420_v41 = vmul.f32 %v416_v25, %v1863_v17  ;;  %v414_v46 = vadd.f32 %v410_v28, %v1888_v32  ;;  %v419_v52 = vmul.f32 %v416_v25, %v1861_v16 }
 0x180   :  { %v413_v53 = vadd.f32 %v409_v35, %v1897_v42  ;;  %v418_v38 = vmul.f32 %v416_v25, %v1901_v44  ;;  %v429_v36 = vmul.f32 %v425_v26, %v1865_v18  ;;  %v412_v59 = vadd.f32 %v408_v37, %v1917_v57 }
 0x181   :  { %v424_v29 = vadd.f32 %v420_v41, %v415_v39  ;;  %v417_v48 = vmul.f32 %v416_v25, %v1906_v51  ;;  %v423_v63 = vadd.f32 %v419_v52, %v414_v46  ;;  %v428_v2 = vmul.f32 %v425_v26, %v1886_v30 }
 0x182   :  { %v422_v0 = vadd.f32 %v418_v38, %v413_v53  ;;  %v427_v11 = vmul.f32 %v425_v26, %v1899_v43  ;;  %v426_v28 = vmul.f32 %v425_v26, %v1915_v56 }
 0x183   :  { %v433_v60 = vadd.f32 %v429_v36, %v424_v29  ;;  %v421_v14 = vadd.f32 %v417_v48, %v412_v59  ;;  %v432_v31 = vadd.f32 %v428_v2, %v423_v63 }
 0x184   :  { %v431_v1 = vadd.f32 %v427_v11, %v422_v0 }
 0x185   :  { %1564 = vtanh.f32 %v433_v60  ;;  %v430_v35 = vadd.f32 %v426_v28, %v421_v14 }
 0x186   :  { %1566 = vtanh.f32 %v432_v31 }
 0x187   :  { %1568 = vtanh.f32 %v431_v1 }
 0x188   :  { %1570 = vtanh.f32 %v430_v35 }
 0x18b   :  { %v1565_v39 = vpop.eup %1564 }
 0x18c   :  { %450 = vmatpush.msrb.mxu0 %v1565_v39  ;;  %1504 = vmatpush.msra.mxu1 %v1565_v39  ;;  %v1567_v25 = vpop.eup %1566 }
 0x18d   :  { %v1569_v37 = vpop.eup %1568 }
 0x18e   :  { %451 = vmatpush.msrb.mxu0 %v1567_v25  ;;  %1505 = vmatpush.msra.mxu1 %v1567_v25  ;;  %v1571_v41 = vpop.eup %1570 }
 0x190   :  { %452 = vmatpush.msrb.mxu0 %v1569_v37  ;;  %1506 = vmatpush.msra.mxu1 %v1569_v37 }
 0x192   :  { %453 = vmatpush.msrb.mxu0 %v1571_v41  ;;  %1507 = vmatpush.msra.mxu1 %v1571_v41 }
 0x193   :  { %1476 = vmatmul.msk.f32.vlgmr.msrb.gmra.mxu0 %vm251_vm0, %v1932_v3  ;;  %1477 = vmatmul.msk.f32.vlgmr.msra.gmra.mxu1 %vm251_vm0, %v1937_v5 }
 0x19b   :  { %1478 = vmatmul.msk.f32.gmra.mxu1 %vm251_vm0, %v1950_v8 }
 0x1a3   :  { %1479 = vmatmul.msk.f32.gmra.mxu1 %vm251_vm0, %v1960_v4 }
 0x210   :  { %v455_v26 = vpop.f32.mrf.mxu0  ;;  %v458_v46 = vpop.f32.mrf.mxu1 }
 0x211   :  { %v456_v52 = vadd.f32 %v455_v26, %v1968_v10  ;;  %v459_v53 = vadd.f32 %v458_v46, %v1966_v9 }
 0x213   :  { %v471_v38 = vand.u32 2147483647, %v456_v52  ;;  %v472_v29 = vand.u32 2147483647, %v459_v53 }
 0x215   :  { %v475_v36 = vsub.f32 0.0, %v471_v38  ;;  %v476_v59 = vsub.f32 0.0, %v472_v29 }
 0x217   :  { %v479_v48 = vmul.f32 1.442695, %v475_v36  ;;  %v481_v63 = vmul.f32 1.442695, %v476_v59 }
 0x218   :  { %v461_v2 = vpop.f32.mrf.mxu1 }
 0x219   :  { %1572 = vpow2.f32 %v479_v48  ;;  %v462_v0 = vadd.f32 %v461_v2, %v1973_v13 }
 0x21a   :  { %1574 = vpow2.f32 %v481_v63 }
 0x21b   :  { %v473_v60 = vand.u32 2147483647, %v462_v0 }
 0x21d   :  { %v477_v11 = vsub.f32 0.0, %v473_v60 }
 0x21f   :  { %v1573_v14 = vpop.eup %1572  ;;  %v483_v31 = vmul.f32 1.442695, %v477_v11 }
 0x220   :  { %v1575_v1 = vpop.eup %1574  ;;  %v487_v28 = vadd.f32 1.0, %v1573_v14  ;;  %v464_v35 = vpop.f32.mrf.mxu1  ;;  %v490_v46 = vmul.f32 -0.5, %v1573_v14  ;;  %v493_v11 = vand.u32 2147483647, %v1573_v14 }
 0x221   :  { %v496_v39 = vadd.f32 1.0, %v1575_v1  ;;  %1576 = vpow2.f32 %v483_v31  ;;  %v2086_v25 = vadd.f32 %v464_v35, %v1990_v40  ;;  %v499_v38 = vmul.f32 -0.5, %v1575_v1 }
 0x222   :  { %1578 = vlog2.f32 %v487_v28  ;;  %v491_v2 = vadd.f32 1.0, %v490_v46  ;;  %v502_v31 = vand.u32 2147483647, %v1575_v1  ;;  %vm494_vm5 = vcmp.lt.f32.partialorder %v493_v11, 0.0004427343 }
 0x223   :  { %v474_v37 = vand.u32 2147483647, %v2086_v25  ;;  %1580 = vlog2.f32 %v496_v39  ;;  %v500_v60 = vadd.f32 1.0, %v499_v38  ;;  %v468_v46 = vmax.f32 %v459_v53, 0.0 }
 0x224   :  { %vm503_vm6 = vcmp.lt.f32.partialorder %v502_v31, 0.0004427343 }
 0x225   :  { %v478_v41 = vsub.f32 0.0, %v474_v37  ;;  %v492_v37 = vmul.f32 %v1573_v14, %v491_v2  ;;  %v501_v9 = vmul.f32 %v1575_v1, %v500_v60 }
 0x227   :  { %v1577_v26 = vpop.eup %1576  ;;  %v485_v36 = vmul.f32 1.442695, %v478_v41 }
 0x228   :  { %v505_v29 = vadd.f32 1.0, %v1577_v26  ;;  %v1579_v59 = vpop.eup %1578  ;;  %v508_v48 = vmul.f32 -0.5, %v1577_v26  ;;  %v511_v13 = vand.u32 2147483647, %v1577_v26 }
 0x229   :  { %v1581_v63 = vpop.eup %1580  ;;  %v489_v35 = vmul.f32 0.6931472, %v1579_v59 }
 0x22a   :  { %1582 = vlog2.f32 %v505_v29  ;;  %v498_v28 = vmul.f32 0.6931472, %v1581_v63  ;;  %v509_v40 = vadd.f32 1.0, %v508_v48  ;;  %vm512_vm7 = vcmp.lt.f32.partialorder %v511_v13, 0.0004427343 }
 0x22b   :  { %1584 = vpow2.f32 %v485_v36  ;;  %v495_v4 = vsel %vm494_vm5, %v492_v37, %v489_v35  ;;  %v467_v36 = vmax.f32 %v456_v52, 0.0  ;;  %v469_v63 = vmax.f32 %v462_v0, 0.0 }
 0x22c   :  { %v504_v29 = vsel %vm503_vm6, %v501_v9, %v498_v28  ;;  %v510_v8 = vmul.f32 %v1577_v26, %v509_v40  ;;  %v470_v26 = vmax.f32 %v2086_v25, 0.0 }
 0x22d   :  { %v523_v59 = vadd.f32 %v495_v4, %v467_v36  ;;  %v524_v48 = vadd.f32 %v504_v29, %v468_v46 }
 0x22f   :  { %v527_v2 = vmul.f32 %v523_v59, %v1979_v22  ;;  %v543_v60 = vmul.f32 %v523_v59, %v2002_v6  ;;  %v528_v9 = vmul.f32 %v524_v48, %v1982_v27  ;;  %v544_v40 = vmul.f32 %v524_v48, %v1987_v34 }
 0x230   :  { %v1583_v39 = vpop.eup %1582  ;;  %v562_v13 = vmul.f32 %v523_v59, %v2000_v62 }
 0x231   :  { %v1585_v10 = vpop.eup %1584  ;;  %v507_v41 = vmul.f32 0.6931472, %v1583_v39  ;;  %v531_v11 = vadd.f32 %v528_v9, %v527_v2  ;;  %v547_v31 = vadd.f32 %v544_v40, %v543_v60 }
 0x232   :  { %v514_v5 = vadd.f32 1.0, %v1585_v10  ;;  %v517_v38 = vmul.f32 -0.5, %v1585_v10  ;;  %v520_v1 = vand.u32 2147483647, %v1585_v10 }
 0x233   :  { %v513_v3 = vsel %vm512_vm7, %v510_v8, %v507_v41  ;;  %v563_v8 = vmul.f32 %v524_v48, %v2011_v61 }
 0x234   :  { %1586 = vlog2.f32 %v514_v5  ;;  %v525_v56 = vadd.f32 %v513_v3, %v469_v63  ;;  %v518_v14 = vadd.f32 1.0, %v517_v38  ;;  %vm521_vm8 = vcmp.lt.f32.partialorder %v520_v1, 0.0004427343 }
 0x235   :  { %v566_v28 = vadd.f32 %v563_v8, %v562_v13 }
 0x236   :  { %v529_v5 = vmul.f32 %v525_v56, %v1992_v47  ;;  %v545_v4 = vmul.f32 %v525_v56, %v1998_v50  ;;  %v519_v53 = vmul.f32 %v1585_v10, %v518_v14  ;;  %v564_v0 = vmul.f32 %v525_v56, %v2013_v7 }
 0x238   :  { %v532_v37 = vadd.f32 %v531_v11, %v529_v5  ;;  %v548_v41 = vadd.f32 %v547_v31, %v545_v4  ;;  %v567_v29 = vadd.f32 %v566_v28, %v564_v0 }
 0x23a   :  { %v1587_v52 = vpop.eup %1586 }
 0x23b   :  { %v516_v3 = vmul.f32 0.6931472, %v1587_v52 }
 0x23d   :  { %v522_v35 = vsel %vm521_vm8, %v519_v53, %v516_v3 }
 0x23e   :  { %v526_v39 = vadd.f32 %v522_v35, %v470_v26 }
 0x240   :  { %v530_v36 = vmul.f32 %v526_v39, %v2004_v21  ;;  %v546_v46 = vmul.f32 %v526_v39, %v2007_v55  ;;  %v565_v38 = vmul.f32 %v526_v39, %v2025_v49 }
 0x242   :  { %v533_v10 = vadd.f32 %v532_v37, %v530_v36  ;;  %v549_v59 = vadd.f32 %v548_v41, %v546_v46  ;;  %v568_v56 = vadd.f32 %v567_v29, %v565_v38 }
 0x244   :  { %v534_v48 = vrot.slane %v533_v10, 4  ;;  %v550_v25 = vrot.slane %v549_v59, 4  ;;  %v569_v63 = vrot.slane %v568_v56, 4 }
 0x246   :  { %v535_v14 = vadd.f32 %v534_v48, %v533_v10  ;;  %v551_v1 = vadd.f32 %v550_v25, %v549_v59  ;;  %v570_v2 = vadd.f32 %v569_v63, %v568_v56 }
 0x248   :  { %v536_v60 = vrot.slane %v535_v14, 2  ;;  %v552_v9 = vrot.slane %v551_v1, 2  ;;  %v571_v40 = vrot.slane %v570_v2, 2 }
 0x24a   :  { %v537_v52 = vadd.f32 %v536_v60, %v535_v14  ;;  %v553_v13 = vadd.f32 %v552_v9, %v551_v1  ;;  %v572_v8 = vadd.f32 %v571_v40, %v570_v2 }
 0x24c   :  { %v538_v5 = vrot.slane %v537_v52, 1  ;;  %v554_v4 = vrot.slane %v553_v13, 1  ;;  %v573_v3 = vrot.slane %v572_v8, 1 }
 0x24e   :  { %v539_v53 = vadd.f32 %v538_v5, %v537_v52  ;;  %v555_v0 = vadd.f32 %v554_v4, %v553_v13  ;;  %v574_v26 = vadd.f32 %v573_v3, %v572_v8 }
 0x250   :  { %v540_v11 = vadd.f32 %v539_v53, %v2030_v45  ;;  %v556_v31 = vadd.f32 %v555_v0, %v2030_v45  ;;  %v575_v35 = vadd.f32 %v574_v26, %v2030_v45 }
 0x252   :  { %v541_v28 = vmul.f32 %v540_v11, %v2032_v58  ;;  %v557_v39 = vmul.f32 %v556_v31, %v2032_v58  ;;  %v576_v37 = vmul.f32 %v575_v35, %v2032_v58  ;;  %v2503_v31 = vld [vmem:[#allocation8_spill] sm:$0xff] }
 0x254   :  { %v2109_v41 = vadd.f32 %v541_v28, %v2049_v54  ;;  %v559_v29 = vrot.slane %v557_v39, 1  ;;  %v578_v36 = vrot.slane %v576_v37, 2 }
 0x256   :  { %v2112_v46 = vadd.f32 %v559_v29, %v2051_v12  ;;  %v2115_v38 = vadd.f32 %v578_v36, %v2053_v20  ;;  %v581_v10 = vperm.slane %v2109_v41, 0 }
 0x258   :  { %v585_v59 = vmul.f32 %v581_v10, %v1878_v23  ;;  %v590_v56 = vperm.slane %v2112_v46, 0  ;;  %v599_v48 = vperm.slane %v2115_v38, 0  ;;  %v584_v25 = vmul.f32 %v581_v10, %v1890_v33 }
 0x259   :  { %v583_v54 = vmul.f32 %v581_v10, %v1859_v15  ;;  %v582_v63 = vmul.f32 %v581_v10, %v1867_v19  ;;  %v2504_v10 = vld [vmem:[#allocation9_spill] sm:$0xff] }
 0x25a   :  { %v589_v12 = vadd.f32 %v585_v59, %v1880_v24  ;;  %v594_v14 = vmul.f32 %v590_v56, %v1863_v17  ;;  %v588_v20 = vadd.f32 %v584_v25, %v1888_v32  ;;  %v593_v1 = vmul.f32 %v590_v56, %v1861_v16  ;;  %v2505_v59 = vld [vmem:[#allocation10_spill] sm:$0xff] }
 0x25b   :  { %v587_v2 = vadd.f32 %v583_v54, %v1897_v42  ;;  %v592_v60 = vmul.f32 %v590_v56, %v1901_v44  ;;  %v603_v40 = vmul.f32 %v599_v48, %v1865_v18  ;;  %v586_v52 = vadd.f32 %v582_v63, %v1917_v57  ;;  %v2508_v54 = vld [vmem:[#allocation14_spill] sm:$0xff] }
 0x25c   :  { %v598_v9 = vadd.f32 %v594_v14, %v589_v12  ;;  %v591_v13 = vmul.f32 %v590_v56, %v1906_v51  ;;  %v597_v8 = vadd.f32 %v593_v1, %v588_v20  ;;  %v602_v5 = vmul.f32 %v599_v48, %v1886_v30  ;;  %v2506_v56 = vld [vmem:[#allocation11_spill] sm:$0xff]  ;;  %v2509_v1 = vld [vmem:[#allocation13_spill] sm:$0xff] }
 0x25d   :  { %v596_v4 = vadd.f32 %v592_v60, %v587_v2  ;;  %v601_v53 = vmul.f32 %v599_v48, %v1899_v43  ;;  %v600_v35 = vmul.f32 %v599_v48, %v2503_v31  ;;  %v2507_v48 = vld [vmem:[#allocation12_spill] sm:$0xff] }
 0x25e   :  { %v607_v3 = vadd.f32 %v603_v40, %v598_v9  ;;  %v595_v0 = vadd.f32 %v591_v13, %v586_v52  ;;  %v606_v26 = vadd.f32 %v602_v5, %v597_v8  ;;  %v2510_v8 = vld [vmem:[#allocation15_spill] sm:$0xff] }
 0x25f   :  { %v605_v11 = vadd.f32 %v601_v53, %v596_v4 }
 0x260   :  { %1588 = vtanh.f32 %v607_v3  ;;  %v604_v28 = vadd.f32 %v600_v35, %v595_v0 }
 0x261   :  { %1590 = vtanh.f32 %v606_v26 }
 0x262   :  { %1592 = vtanh.f32 %v605_v11 }
 0x263   :  { %1594 = vtanh.f32 %v604_v28 }
 0x266   :  { %v1589_v39 = vpop.eup %1588 }
 0x267   :  { %624 = vmatpush.msra.mxu0 %v1589_v39  ;;  %1508 = vmatpush.msra.mxu2 %v1589_v39  ;;  %v1591_v37 = vpop.eup %1590  ;;  %v2511_v39 = vld [vmem:[#allocation16_spill] sm:$0xff] }
 0x268   :  { %v1593_v29 = vpop.eup %1592 }
 0x269   :  { %625 = vmatpush.msra.mxu0 %v1591_v37  ;;  %1509 = vmatpush.msra.mxu2 %v1591_v37  ;;  %v1595_v36 = vpop.eup %1594 }
 0x26b   :  { %626 = vmatpush.msra.mxu0 %v1593_v29  ;;  %1510 = vmatpush.msra.mxu2 %v1593_v29 }
 0x26d   :  { %627 = vmatpush.msra.mxu0 %v1595_v36  ;;  %1511 = vmatpush.msra.mxu2 %v1595_v36 }
 0x26e   :  { %1480 = vmatmul.msk.f32.vlgmr.msra.gmra.mxu0 %vm251_vm0, %v2504_v10  ;;  %1481 = vmatmul.msk.f32.vlgmr.msra.gmra.mxu2 %vm251_vm0, %v2505_v59 }
 0x276   :  { %1482 = vmatmul.msk.f32.gmra.mxu2 %vm251_vm0, %v2506_v56 }
 0x27e   :  { %1483 = vmatmul.msk.f32.gmra.mxu2 %vm251_vm0, %v2507_v48 }
 0x2eb   :  { %v629_v25 = vpop.f32.mrf.mxu0 }
 0x2ec   :  { %v2145_v63 = vadd.f32 %v629_v25, %v2508_v54 }
 0x2ee   :  { %v645_v12 = vand.u32 2147483647, %v2145_v63 }
 0x2f0   :  { %v649_v14 = vsub.f32 0.0, %v645_v12 }
 0x2f1   :  { %v632_v20 = vpop.f32.mrf.mxu2 }
 0x2f2   :  { %v633_v2 = vadd.f32 %v632_v20, %v2509_v1  ;;  %v653_v60 = vmul.f32 1.442695, %v649_v14 }
 0x2f4   :  { %v646_v9 = vand.u32 2147483647, %v633_v2  ;;  %1596 = vpow2.f32 %v653_v60 }
 0x2f6   :  { %v650_v40 = vsub.f32 0.0, %v646_v9 }
 0x2f8   :  { %v655_v52 = vmul.f32 1.442695, %v650_v40 }
 0x2f9   :  { %v635_v13 = vpop.f32.mrf.mxu2 }
 0x2fa   :  { %1598 = vpow2.f32 %v655_v52  ;;  %v636_v5 = vadd.f32 %v635_v13, %v2510_v8  ;;  %v1597_v3 = vpop.eup %1596 }
 0x2fb   :  { %v661_v11 = vadd.f32 1.0, %v1597_v3  ;;  %v664_v56 = vmul.f32 -0.5, %v1597_v3  ;;  %v667_v52 = vand.u32 2147483647, %v1597_v3 }
 0x2fc   :  { %v647_v4 = vand.u32 2147483647, %v636_v5 }
 0x2fd   :  { %v665_v9 = vadd.f32 1.0, %v664_v56  ;;  %vm668_vm10 = vcmp.lt.f32.partialorder %v667_v52, 0.0004427343  ;;  %v641_v56 = vmax.f32 %v2145_v63, 0.0 }
 0x2fe   :  { %v651_v53 = vsub.f32 0.0, %v647_v4 }
 0x300   :  { %v1599_v0 = vpop.eup %1598  ;;  %v657_v26 = vmul.f32 1.442695, %v651_v53 }
 0x301   :  { %v670_v35 = vadd.f32 1.0, %v1599_v0  ;;  %v638_v28 = vpop.f32.mrf.mxu2  ;;  %v673_v10 = vmul.f32 -0.5, %v1599_v0  ;;  %v676_v40 = vand.u32 2147483647, %v1599_v0 }
 0x302   :  { %1600 = vpow2.f32 %v657_v26  ;;  %v2151_v37 = vadd.f32 %v638_v28, %v2511_v39  ;;  %v666_v28 = vmul.f32 %v1597_v3, %v665_v9 }
 0x303   :  { %1602 = vlog2.f32 %v670_v35  ;;  %v674_v60 = vadd.f32 1.0, %v673_v10  ;;  %vm677_vm9 = vcmp.lt.f32.partialorder %v676_v40, 0.0004427343 }
 0x304   :  { %v648_v29 = vand.u32 2147483647, %v2151_v37  ;;  %1604 = vlog2.f32 %v661_v11 }
 0x305   :  { %v675_v26 = vmul.f32 %v1599_v0, %v674_v60 }
 0x306   :  { %v652_v36 = vsub.f32 0.0, %v648_v29 }
 0x308   :  { %v1601_v59 = vpop.eup %1600  ;;  %v659_v48 = vmul.f32 1.442695, %v652_v36  ;;  %v642_v36 = vmax.f32 %v633_v2, 0.0 }
 0x309   :  { %v679_v25 = vadd.f32 1.0, %v1601_v59  ;;  %v1603_v12 = vpop.eup %1602  ;;  %v682_v14 = vmul.f32 -0.5, %v1601_v59  ;;  %v685_v11 = vand.u32 2147483647, %v1601_v59 }
 0x30a   :  { %1606 = vpow2.f32 %v659_v48  ;;  %v1605_v20 = vpop.eup %1604  ;;  %v672_v13 = vmul.f32 0.6931472, %v1603_v12 }
 0x30b   :  { %1608 = vlog2.f32 %v679_v25  ;;  %v663_v4 = vmul.f32 0.6931472, %v1605_v20  ;;  %v683_v53 = vadd.f32 1.0, %v682_v14  ;;  %vm686_vm11 = vcmp.lt.f32.partialorder %v685_v11, 0.0004427343 }
 0x30c   :  { %v678_v39 = vsel %vm677_vm9, %v675_v26, %v672_v13  ;;  %v643_v14 = vmax.f32 %v636_v5, 0.0  ;;  %v644_v26 = vmax.f32 %v2151_v37, 0.0 }
 0x30d   :  { %v669_v48 = vsel %vm668_vm10, %v666_v28, %v663_v4  ;;  %v684_v10 = vmul.f32 %v1601_v59, %v683_v53  ;;  %v698_v12 = vadd.f32 %v678_v39, %v642_v36 }
 0x30e   :  { %v697_v20 = vadd.f32 %v669_v48, %v641_v56 }
 0x30f   :  { %v702_v40 = vmul.f32 %v698_v12, %v1982_v27  ;;  %v718_v2 = vmul.f32 %v698_v12, %v1987_v34  ;;  %v737_v63 = vmul.f32 %v698_v12, %v2011_v61 }
 0x310   :  { %v1607_v35 = vpop.eup %1606  ;;  %v701_v13 = vmul.f32 %v697_v20, %v1979_v22  ;;  %v717_v59 = vmul.f32 %v697_v20, %v2002_v6  ;;  %v736_v4 = vmul.f32 %v697_v20, %v2000_v62 }
 0x311   :  { %v1609_v29 = vpop.eup %1608  ;;  %v688_v8 = vadd.f32 1.0, %v1607_v35  ;;  %v691_v25 = vmul.f32 -0.5, %v1607_v35  ;;  %v694_v9 = vand.u32 2147483647, %v1607_v35 }
 0x312   :  { %v681_v1 = vmul.f32 0.6931472, %v1609_v29  ;;  %v705_v11 = vadd.f32 %v702_v40, %v701_v13  ;;  %v721_v28 = vadd.f32 %v718_v2, %v717_v59  ;;  %v740_v36 = vadd.f32 %v737_v63, %v736_v4 }
 0x313   :  { %1610 = vlog2.f32 %v688_v8  ;;  %v692_v3 = vadd.f32 1.0, %v691_v25  ;;  %vm695_vm12 = vcmp.lt.f32.partialorder %v694_v9, 0.0004427343 }
 0x314   :  { %v687_v0 = vsel %vm686_vm11, %v684_v10, %v681_v1 }
 0x315   :  { %v699_v60 = vadd.f32 %v687_v0, %v643_v14  ;;  %v693_v39 = vmul.f32 %v1607_v35, %v692_v3 }
 0x317   :  { %v703_v8 = vmul.f32 %v699_v60, %v1992_v47  ;;  %v719_v5 = vmul.f32 %v699_v60, %v1998_v50  ;;  %v738_v53 = vmul.f32 %v699_v60, %v2013_v7 }
 0x319   :  { %v1611_v52 = vpop.eup %1610  ;;  %v706_v10 = vadd.f32 %v705_v11, %v703_v8  ;;  %v722_v25 = vadd.f32 %v721_v28, %v719_v5  ;;  %v741_v56 = vadd.f32 %v740_v36, %v738_v53 }
 0x31a   :  { %v690_v1 = vmul.f32 0.6931472, %v1611_v52 }
 0x31c   :  { %v696_v29 = vsel %vm695_vm12, %v693_v39, %v690_v1 }
 0x31d   :  { %v700_v48 = vadd.f32 %v696_v29, %v644_v26 }
 0x31f   :  { %v704_v12 = vmul.f32 %v700_v48, %v2004_v21  ;;  %v720_v14 = vmul.f32 %v700_v48, %v2007_v55  ;;  %v739_v35 = vmul.f32 %v700_v48, %v2025_v49 }
 0x321   :  { %v707_v0 = vadd.f32 %v706_v10, %v704_v12  ;;  %v723_v20 = vadd.f32 %v722_v25, %v720_v14  ;;  %v742_v60 = vadd.f32 %v741_v56, %v739_v35 }
 0x323   :  { %v708_v3 = vrot.slane %v707_v0, 4  ;;  %v724_v37 = vrot.slane %v723_v20, 4  ;;  %v743_v9 = vrot.slane %v742_v60, 4 }
 0x325   :  { %v709_v40 = vadd.f32 %v708_v3, %v707_v0  ;;  %v725_v2 = vadd.f32 %v724_v37, %v723_v20  ;;  %v744_v52 = vadd.f32 %v743_v9, %v742_v60 }
 0x327   :  { %v710_v13 = vrot.slane %v709_v40, 2  ;;  %v726_v59 = vrot.slane %v725_v2, 2  ;;  %v745_v63 = vrot.slane %v744_v52, 2 }
 0x329   :  { %v711_v8 = vadd.f32 %v710_v13, %v709_v40  ;;  %v727_v5 = vadd.f32 %v726_v59, %v725_v2  ;;  %v746_v1 = vadd.f32 %v745_v63, %v744_v52 }
 0x32b   :  { %v712_v39 = vrot.slane %v711_v8, 1  ;;  %v728_v4 = vrot.slane %v727_v5, 1  ;;  %v747_v53 = vrot.slane %v746_v1, 1 }
 0x32d   :  { %v713_v26 = vadd.f32 %v712_v39, %v711_v8  ;;  %v729_v11 = vadd.f32 %v728_v4, %v727_v5  ;;  %v748_v28 = vadd.f32 %v747_v53, %v746_v1 }
 0x32f   :  { %v714_v29 = vadd.f32 %v713_v26, %v2030_v45  ;;  %v730_v36 = vadd.f32 %v729_v11, %v2030_v45  ;;  %v749_v48 = vadd.f32 %v748_v28, %v2030_v45 }
 0x331   :  { %v715_v10 = vmul.f32 %v714_v29, %v2032_v58  ;;  %v731_v25 = vmul.f32 %v730_v36, %v2032_v58  ;;  %v750_v56 = vmul.f32 %v749_v48, %v2032_v58 }
 0x333   :  { %v733_v12 = vrot.slane %v731_v25, 1  ;;  %v2175_v14 = vadd.f32 %v715_v10, %v2109_v41  ;;  %v752_v35 = vrot.slane %v750_v56, 2 }
 0x335   :  { %v2178_v0 = vadd.f32 %v733_v12, %v2112_v46  ;;  %v2181_v20 = vadd.f32 %v752_v35, %v2115_v38  ;;  %v755_v60 = vperm.slane %v2175_v14, 0 }
 0x337   :  { %v759_v3 = vmul.f32 %v755_v60, %v1878_v23  ;;  %v764_v37 = vperm.slane %v2178_v0, 0  ;;  %v773_v9 = vperm.slane %v2181_v20, 0  ;;  %v758_v40 = vmul.f32 %v755_v60, %v1890_v33 }
 0x338   :  { %v757_v41 = vmul.f32 %v755_v60, %v1859_v15  ;;  %v756_v2 = vmul.f32 %v755_v60, %v1867_v19 }
 0x339   :  { %v763_v46 = vadd.f32 %v759_v3, %v1880_v24  ;;  %v768_v52 = vmul.f32 %v764_v37, %v1863_v17  ;;  %v762_v38 = vadd.f32 %v758_v40, %v1888_v32  ;;  %v767_v13 = vmul.f32 %v764_v37, %v1861_v16  ;;  %v2205_v3 = vld [vmem:[%s2468_s4] sm:$0xff]  ;;  %v2226_v40 = vld [vmem:[%s2468_s4 + $0x18] sm:$0xff] }
 0x33a   :  { %v761_v59 = vadd.f32 %v757_v41, %v1897_v42  ;;  %v766_v63 = vmul.f32 %v764_v37, %v1901_v44  ;;  %v777_v5 = vmul.f32 %v773_v9, %v1865_v18  ;;  %v760_v1 = vadd.f32 %v756_v2, %v1917_v57  ;;  %2514 = vst [vmem:[#allocation10_spill] sm:$0xff] %v2226_v40 }
 0x33b   :  { %v772_v8 = vadd.f32 %v768_v52, %v763_v46  ;;  %v765_v39 = vmul.f32 %v764_v37, %v1906_v51  ;;  %v771_v4 = vadd.f32 %v767_v13, %v762_v38  ;;  %v776_v53 = vmul.f32 %v773_v9, %v1886_v30  ;;  %v2212_v37 = vld [vmem:[%s2468_s4 + $0x8] sm:$0xff] }
 0x33c   :  { %v770_v26 = vadd.f32 %v766_v63, %v761_v59  ;;  %v775_v28 = vmul.f32 %v773_v9, %v1899_v43  ;;  %v774_v10 = vmul.f32 %v773_v9, %v2503_v31  ;;  %2512 = vst [vmem:[#allocation8_spill] sm:$0xff] %v2212_v37  ;;  %v2219_v9 = vld [vmem:[%s2468_s4 + $0x10] sm:$0xff]  ;;  %s1756_s4 = smov [#allocation5]  }
 0x33d   :  { %v781_v11 = vadd.f32 %v777_v5, %v772_v8  ;;  %v769_v29 = vadd.f32 %v765_v39, %v760_v1  ;;  %v780_v36 = vadd.f32 %v776_v53, %v771_v4  ;;  %2513 = vst [vmem:[#allocation9_spill] sm:$0xff] %v2219_v9  ;;  %v2515_v13 = vld [vmem:[#allocation13_spill] sm:$0xff]  ;;  %v2516_v4 = vld [vmem:[#allocation15_spill] sm:$0xff]  ;;  %s1459_s5 = sshll.u32 %s1756_s4, 4  ;;  %s1460_s5 = int_to_ptr.vmem [resolvable:$true] %s1459_s5 }
 0x33e   :  { %v779_v48 = vadd.f32 %v775_v28, %v770_v26 }
 0x33f   :  { %1612 = vtanh.f32 %v781_v11  ;;  %v778_v25 = vadd.f32 %v774_v10, %v769_v29 }
 0x340   :  { %1614 = vtanh.f32 %v780_v36 }
 0x341   :  { %1616 = vtanh.f32 %v779_v48 }
 0x342   :  { %1618 = vtanh.f32 %v778_v25 }
 0x345   :  { %v1613_v56 = vpop.eup %1612 }
 0x346   :  { %798 = vmatpush.msrb.mxu3 %v1613_v56  ;;  %v1615_v12 = vpop.eup %1614  ;;  %v2517_v56 = vld [vmem:[#allocation16_spill] sm:$0xff] }
 0x347   :  { %v1617_v35 = vpop.eup %1616 }
 0x348   :  { %799 = vmatpush.msrb.mxu3 %v1615_v12  ;;  %v1619_v60 = vpop.eup %1618 }
 0x34a   :  { %800 = vmatpush.msrb.mxu3 %v1617_v35 }
 0x34c   :  { %801 = vmatpush.msrb.mxu3 %v1619_v60 }
 0x34d   :  { %1484 = vmatmul.msk.f32.vlgmr.msrb.gmra.mxu3 %vm251_vm0, %v2205_v3 }
 0x355   :  { %1485 = vmatmul.msk.f32.gmra.mxu3 %vm251_vm0, %v2212_v37 }
 0x35d   :  { %1486 = vmatmul.msk.f32.gmra.mxu3 %vm251_vm0, %v2219_v9 }
 0x365   :  { %1487 = vmatmul.msk.f32.gmra.mxu3 %vm251_vm0, %v2226_v40 }
 0x3d0   :  { %v803_v41 = vpop.f32.mrf.mxu3 }
 0x3d1   :  { %v2231_v2 = vadd.f32 %v803_v41, %v2508_v54 }
 0x3d3   :  { %v819_v46 = vand.u32 2147483647, %v2231_v2 }
 0x3d5   :  { %v823_v52 = vsub.f32 0.0, %v819_v46 }
 0x3d7   :  { %v827_v63 = vmul.f32 1.442695, %v823_v52 }
 0x3d8   :  { %v806_v38 = vpop.f32.mrf.mxu3 }
 0x3d9   :  { %v807_v59 = vadd.f32 %v806_v38, %v2515_v13  ;;  %1620 = vpow2.f32 %v827_v63 }
 0x3db   :  { %v820_v8 = vand.u32 2147483647, %v807_v59 }
 0x3dd   :  { %v824_v5 = vsub.f32 0.0, %v820_v8 }
 0x3df   :  { %v829_v1 = vmul.f32 1.442695, %v824_v5  ;;  %v1621_v11 = vpop.eup %1620 }
 0x3e0   :  { %v809_v39 = vpop.f32.mrf.mxu3  ;;  %v835_v48 = vadd.f32 1.0, %v1621_v11  ;;  %v838_v52 = vmul.f32 -0.5, %v1621_v11 }
 0x3e1   :  { %1622 = vpow2.f32 %v829_v1  ;;  %v810_v53 = vadd.f32 %v809_v39, %v2516_v4 }
 0x3e3   :  { %v821_v26 = vand.u32 2147483647, %v810_v53 }
 0x3e5   :  { %v825_v28 = vsub.f32 0.0, %v821_v26  ;;  %v839_v26 = vadd.f32 1.0, %v838_v52  ;;  %v815_v52 = vmax.f32 %v2231_v2, 0.0 }
 0x3e7   :  { %v1623_v29 = vpop.eup %1622  ;;  %v831_v36 = vmul.f32 1.442695, %v825_v28  ;;  %v840_v13 = vmul.f32 %v1621_v11, %v839_v26 }
 0x3e8   :  { %v844_v10 = vadd.f32 1.0, %v1623_v29  ;;  %v812_v25 = vpop.f32.mrf.mxu3  ;;  %v847_v41 = vmul.f32 -0.5, %v1623_v29  ;;  %v850_v28 = vand.u32 2147483647, %v1623_v29 }
 0x3e9   :  { %1624 = vpow2.f32 %v831_v36  ;;  %v2237_v12 = vadd.f32 %v812_v25, %v2517_v56  ;;  %v841_v36 = vand.u32 2147483647, %v1621_v11 }
 0x3ea   :  { %1626 = vlog2.f32 %v844_v10  ;;  %v848_v39 = vadd.f32 1.0, %v847_v41  ;;  %vm851_vm13 = vcmp.lt.f32.partialorder %v850_v28, 0.0004427343 }
 0x3eb   :  { %v822_v35 = vand.u32 2147483647, %v2237_v12  ;;  %1628 = vlog2.f32 %v835_v48  ;;  %vm842_vm14 = vcmp.lt.f32.partialorder %v841_v36, 0.0004427343  ;;  %v818_v36 = vmax.f32 %v2237_v12, 0.0 }
 0x3ec   :  { %v849_v4 = vmul.f32 %v1623_v29, %v848_v39 }
 0x3ed   :  { %v826_v60 = vsub.f32 0.0, %v822_v35 }
 0x3ef   :  { %v1625_v46 = vpop.eup %1624  ;;  %v833_v38 = vmul.f32 1.442695, %v826_v60  ;;  %v816_v60 = vmax.f32 %v807_v59, 0.0 }
 0x3f0   :  { %v853_v63 = vadd.f32 1.0, %v1625_v46  ;;  %v1627_v8 = vpop.eup %1626  ;;  %v856_v5 = vmul.f32 -0.5, %v1625_v46  ;;  %v859_v48 = vand.u32 2147483647, %v1625_v46 }
 0x3f1   :  { %1630 = vpow2.f32 %v833_v38  ;;  %v1629_v1 = vpop.eup %1628  ;;  %v846_v25 = vmul.f32 0.6931472, %v1627_v8 }
 0x3f2   :  { %1632 = vlog2.f32 %v853_v63  ;;  %v837_v10 = vmul.f32 0.6931472, %v1629_v1  ;;  %v857_v56 = vadd.f32 1.0, %v856_v5  ;;  %vm860_vm15 = vcmp.lt.f32.partialorder %v859_v48, 0.0004427343 }
 0x3f3   :  { %v852_v40 = vsel %vm851_vm13, %v849_v4, %v846_v25  ;;  %v817_v5 = vmax.f32 %v810_v53, 0.0 }
 0x3f4   :  { %v843_v38 = vsel %vm842_vm14, %v840_v13, %v837_v10  ;;  %v858_v41 = vmul.f32 %v1625_v46, %v857_v56  ;;  %v872_v8 = vadd.f32 %v852_v40, %v816_v60 }
 0x3f5   :  { %v871_v1 = vadd.f32 %v843_v38, %v815_v52 }
 0x3f6   :  { %v876_v28 = vmul.f32 %v872_v8, %v1982_v27  ;;  %v892_v59 = vmul.f32 %v872_v8, %v1987_v34  ;;  %v911_v2 = vmul.f32 %v872_v8, %v2011_v61 }
 0x3f7   :  { %v1631_v35 = vpop.eup %1630  ;;  %v891_v13 = vmul.f32 %v871_v1, %v2002_v6  ;;  %v910_v56 = vmul.f32 %v871_v1, %v2000_v62 }
 0x3f8   :  { %v1633_v54 = vpop.eup %1632  ;;  %v862_v9 = vadd.f32 1.0, %v1631_v35  ;;  %v865_v63 = vmul.f32 -0.5, %v1631_v35  ;;  %v868_v26 = vand.u32 2147483647, %v1631_v35 }
 0x3f9   :  { %v855_v37 = vmul.f32 0.6931472, %v1633_v54  ;;  %v875_v54 = vmul.f32 %v871_v1, %v1979_v22  ;;  %v895_v10 = vadd.f32 %v892_v59, %v891_v13  ;;  %v914_v60 = vadd.f32 %v911_v2, %v910_v56 }
 0x3fa   :  { %1634 = vlog2.f32 %v862_v9  ;;  %v866_v11 = vadd.f32 1.0, %v865_v63  ;;  %vm869_vm1 = vcmp.lt.f32.partialorder %v868_v26, 0.0004427343 }
 0x3fb   :  { %v861_v29 = vsel %vm860_vm15, %v858_v41, %v855_v37  ;;  %v879_v25 = vadd.f32 %v876_v28, %v875_v54 }
 0x3fc   :  { %v873_v39 = vadd.f32 %v861_v29, %v817_v5  ;;  %v867_v53 = vmul.f32 %v1631_v35, %v866_v11 }
 0x3fe   :  { %v877_v9 = vmul.f32 %v873_v39, %v1992_v47  ;;  %v893_v40 = vmul.f32 %v873_v39, %v1998_v50  ;;  %v912_v46 = vmul.f32 %v873_v39, %v2013_v7 }
 0x400   :  { %v1635_v4 = vpop.eup %1634  ;;  %v880_v41 = vadd.f32 %v879_v25, %v877_v9  ;;  %v896_v63 = vadd.f32 %v895_v10, %v893_v40  ;;  %v915_v52 = vadd.f32 %v914_v60, %v912_v46 }
 0x401   :  { %v864_v37 = vmul.f32 0.6931472, %v1635_v4 }
 0x403   :  { %v870_v48 = vsel %vm869_vm1, %v867_v53, %v864_v37 }
 0x404   :  { %v874_v38 = vadd.f32 %v870_v48, %v818_v36 }
 0x406   :  { %v878_v8 = vmul.f32 %v874_v38, %v2004_v21  ;;  %v894_v5 = vmul.f32 %v874_v38, %v2007_v55  ;;  %v913_v35 = vmul.f32 %v874_v38, %v2025_v49 }
 0x408   :  { %v881_v29 = vadd.f32 %v880_v41, %v878_v8  ;;  %v897_v1 = vadd.f32 %v896_v63, %v894_v5  ;;  %v916_v39 = vadd.f32 %v915_v52, %v913_v35 }
 0x40a   :  { %v882_v11 = vrot.slane %v881_v29, 4  ;;  %v898_v12 = vrot.slane %v897_v1, 4  ;;  %v917_v26 = vrot.slane %v916_v39, 4 }
 0x40c   :  { %v883_v28 = vadd.f32 %v882_v11, %v881_v29  ;;  %v899_v59 = vadd.f32 %v898_v12, %v897_v1  ;;  %v918_v4 = vadd.f32 %v917_v26, %v916_v39 }
 0x40e   :  { %v884_v54 = vrot.slane %v883_v28, 2  ;;  %v900_v13 = vrot.slane %v899_v59, 2  ;;  %v919_v2 = vrot.slane %v918_v4, 2 }
 0x410   :  { %v885_v9 = vadd.f32 %v884_v54, %v883_v28  ;;  %v901_v40 = vadd.f32 %v900_v13, %v899_v59  ;;  %v920_v37 = vadd.f32 %v919_v2, %v918_v4 }
 0x412   :  { %v886_v53 = vrot.slane %v885_v9, 1  ;;  %v902_v56 = vrot.slane %v901_v40, 1  ;;  %v921_v46 = vrot.slane %v920_v37, 1 }
 0x414   :  { %v887_v36 = vadd.f32 %v886_v53, %v885_v9  ;;  %v903_v25 = vadd.f32 %v902_v56, %v901_v40  ;;  %v922_v10 = vadd.f32 %v921_v46, %v920_v37 }
 0x416   :  { %v888_v48 = vadd.f32 %v887_v36, %v2030_v45  ;;  %v904_v60 = vadd.f32 %v903_v25, %v2030_v45  ;;  %v923_v38 = vadd.f32 %v922_v10, %v2030_v45 }
 0x418   :  { %v889_v41 = vmul.f32 %v888_v48, %v2032_v58  ;;  %v905_v63 = vmul.f32 %v904_v60, %v2032_v58  ;;  %v924_v52 = vmul.f32 %v923_v38, %v2032_v58 }
 0x41a   :  { %v2261_v8 = vadd.f32 %v889_v41, %v2175_v14  ;;  %v907_v5 = vrot.slane %v905_v63, 1  ;;  %v926_v35 = vrot.slane %v924_v52, 2 }
 0x41c   :  { %v2264_v29 = vadd.f32 %v907_v5, %v2178_v0  ;;  %v2267_v1 = vadd.f32 %v926_v35, %v2181_v20  ;;  %v929_v39 = vperm.slane %v2261_v8, 0 }
 0x41e   :  { %v933_v11 = vmul.f32 %v929_v39, %v1878_v23  ;;  %v938_v12 = vperm.slane %v2264_v29, 0  ;;  %v947_v26 = vperm.slane %v2267_v1, 0  ;;  %v932_v28 = vmul.f32 %v929_v39, %v1890_v33 }
 0x41f   :  { %v931_v14 = vmul.f32 %v929_v39, %v1859_v15  ;;  %v930_v59 = vmul.f32 %v929_v39, %v1867_v19 }
 0x420   :  { %v937_v0 = vadd.f32 %v933_v11, %v1880_v24  ;;  %v942_v4 = vmul.f32 %v938_v12, %v1863_v17  ;;  %v936_v20 = vadd.f32 %v932_v28, %v1888_v32  ;;  %v941_v54 = vmul.f32 %v938_v12, %v1861_v16  ;;  %v2518_v11 = vld [vmem:[#allocation8_spill] sm:$0xff] }
 0x421   :  { %v935_v13 = vadd.f32 %v931_v14, %v1897_v42  ;;  %v940_v2 = vmul.f32 %v938_v12, %v1901_v44  ;;  %v951_v40 = vmul.f32 %v947_v26, %v1865_v18  ;;  %v934_v37 = vadd.f32 %v930_v59, %v1917_v57  ;;  %v2521_v14 = vld [vmem:[#allocation14_spill] sm:$0xff] }
 0x422   :  { %v946_v9 = vadd.f32 %v942_v4, %v937_v0  ;;  %v939_v53 = vmul.f32 %v938_v12, %v1906_v51  ;;  %v945_v56 = vadd.f32 %v941_v54, %v936_v20  ;;  %v950_v46 = vmul.f32 %v947_v26, %v1886_v30  ;;  %v2519_v12 = vld [vmem:[#allocation9_spill] sm:$0xff] }
 0x423   :  { %v944_v36 = vadd.f32 %v940_v2, %v935_v13  ;;  %v949_v10 = vmul.f32 %v947_v26, %v1899_v43  ;;  %v948_v41 = vmul.f32 %v947_v26, %v2503_v31  ;;  %v2520_v26 = vld [vmem:[#allocation10_spill] sm:$0xff]  ;;  %v2522_v54 = vld [vmem:[#allocation13_spill] sm:$0xff] }
 0x424   :  { %v955_v25 = vadd.f32 %v951_v40, %v946_v9  ;;  %v943_v48 = vadd.f32 %v939_v53, %v934_v37  ;;  %v954_v60 = vadd.f32 %v950_v46, %v945_v56  ;;  %v2523_v56 = vld [vmem:[#allocation15_spill] sm:$0xff] }
 0x425   :  { %v953_v38 = vadd.f32 %v949_v10, %v944_v36 }
 0x426   :  { %1636 = vtanh.f32 %v955_v25  ;;  %v952_v63 = vadd.f32 %v948_v41, %v943_v48 }
 0x427   :  { %1638 = vtanh.f32 %v954_v60 }
 0x428   :  { %1640 = vtanh.f32 %v953_v38 }
 0x429   :  { %1642 = vtanh.f32 %v952_v63 }
 0x42c   :  { %v1637_v52 = vpop.eup %1636 }
 0x42d   :  { %972 = vmatpush.msrb.mxu0 %v1637_v52  ;;  %v1639_v5 = vpop.eup %1638  ;;  %v2524_v52 = vld [vmem:[#allocation16_spill] sm:$0xff] }
 0x42e   :  { %v1641_v35 = vpop.eup %1640 }
 0x42f   :  { %973 = vmatpush.msrb.mxu0 %v1639_v5  ;;  %v1643_v39 = vpop.eup %1642 }
 0x431   :  { %974 = vmatpush.msrb.mxu0 %v1641_v35 }
 0x433   :  { %975 = vmatpush.msrb.mxu0 %v1643_v39 }
 0x434   :  { %1488 = vmatmul.msk.f32.vlgmr.msrb.gmra.mxu0 %vm251_vm0, %v2205_v3 }
 0x43c   :  { %1489 = vmatmul.msk.f32.gmra.mxu0 %vm251_vm0, %v2518_v11 }
 0x444   :  { %1490 = vmatmul.msk.f32.gmra.mxu0 %vm251_vm0, %v2519_v12 }
 0x44c   :  { %1491 = vmatmul.msk.f32.gmra.mxu0 %vm251_vm0, %v2520_v26 }
 0x4b1   :  { %v977_v28 = vpop.f32.mrf.mxu0 }
 0x4b2   :  { %v2297_v59 = vadd.f32 %v977_v28, %v2521_v14 }
 0x4b4   :  { %v993_v0 = vand.u32 2147483647, %v2297_v59 }
 0x4b6   :  { %v997_v4 = vsub.f32 0.0, %v993_v0 }
 0x4b8   :  { %v1001_v2 = vmul.f32 1.442695, %v997_v4 }
 0x4b9   :  { %v980_v20 = vpop.f32.mrf.mxu0 }
 0x4ba   :  { %v981_v13 = vadd.f32 %v980_v20, %v2522_v54  ;;  %1644 = vpow2.f32 %v1001_v2 }
 0x4bc   :  { %v994_v9 = vand.u32 2147483647, %v981_v13 }
 0x4be   :  { %v998_v40 = vsub.f32 0.0, %v994_v9 }
 0x4c0   :  { %v1003_v37 = vmul.f32 1.442695, %v998_v40  ;;  %v1645_v25 = vpop.eup %1644 }
 0x4c1   :  { %v983_v53 = vpop.f32.mrf.mxu0  ;;  %v1009_v38 = vadd.f32 1.0, %v1645_v25  ;;  %v1012_v4 = vmul.f32 -0.5, %v1645_v25 }
 0x4c2   :  { %1646 = vpow2.f32 %v1003_v37  ;;  %v984_v46 = vadd.f32 %v983_v53, %v2523_v56 }
 0x4c4   :  { %v995_v36 = vand.u32 2147483647, %v984_v46 }
 0x4c6   :  { %v999_v10 = vsub.f32 0.0, %v995_v36  ;;  %v1013_v36 = vadd.f32 1.0, %v1012_v4  ;;  %v989_v4 = vmax.f32 %v2297_v59, 0.0 }
 0x4c8   :  { %v1647_v48 = vpop.eup %1646  ;;  %v1005_v60 = vmul.f32 1.442695, %v999_v10  ;;  %v1014_v54 = vmul.f32 %v1645_v25, %v1013_v36 }
 0x4c9   :  { %v1018_v41 = vadd.f32 1.0, %v1647_v48  ;;  %v986_v63 = vpop.f32.mrf.mxu0  ;;  %v1021_v28 = vmul.f32 -0.5, %v1647_v48  ;;  %v1024_v10 = vand.u32 2147483647, %v1647_v48 }
 0x4ca   :  { %1648 = vpow2.f32 %v1005_v60  ;;  %v2303_v5 = vadd.f32 %v986_v63, %v2524_v52  ;;  %v1015_v60 = vand.u32 2147483647, %v1645_v25 }
 0x4cb   :  { %1650 = vlog2.f32 %v1018_v41  ;;  %v1022_v53 = vadd.f32 1.0, %v1021_v28  ;;  %vm1025_vm2 = vcmp.lt.f32.partialorder %v1024_v10, 0.0004427343 }
 0x4cc   :  { %v996_v35 = vand.u32 2147483647, %v2303_v5  ;;  %1652 = vlog2.f32 %v1009_v38  ;;  %vm1016_vm3 = vcmp.lt.f32.partialorder %v1015_v60, 0.0004427343  ;;  %v992_v60 = vmax.f32 %v2303_v5, 0.0 }
 0x4cd   :  { %v1023_v56 = vmul.f32 %v1647_v48, %v1022_v53 }
 0x4ce   :  { %v1000_v39 = vsub.f32 0.0, %v996_v35 }
 0x4d0   :  { %v1649_v0 = vpop.eup %1648  ;;  %v1007_v20 = vmul.f32 1.442695, %v1000_v39  ;;  %v990_v39 = vmax.f32 %v981_v13, 0.0 }
 0x4d1   :  { %v1027_v2 = vadd.f32 1.0, %v1649_v0  ;;  %v1651_v9 = vpop.eup %1650  ;;  %v1030_v40 = vmul.f32 -0.5, %v1649_v0  ;;  %v1033_v38 = vand.u32 2147483647, %v1649_v0 }
 0x4d2   :  { %1654 = vpow2.f32 %v1007_v20  ;;  %v1653_v37 = vpop.eup %1652  ;;  %v1020_v63 = vmul.f32 0.6931472, %v1651_v9 }
 0x4d3   :  { %1656 = vlog2.f32 %v1027_v2  ;;  %v1011_v41 = vmul.f32 0.6931472, %v1653_v37  ;;  %v1031_v52 = vadd.f32 1.0, %v1030_v40  ;;  %vm1034_vm4 = vcmp.lt.f32.partialorder %v1033_v38, 0.0004427343 }
 0x4d4   :  { %v1026_v26 = vsel %vm1025_vm2, %v1023_v56, %v1020_v63  ;;  %v991_v40 = vmax.f32 %v984_v46, 0.0 }
 0x4d5   :  { %v1017_v20 = vsel %vm1016_vm3, %v1014_v54, %v1011_v41  ;;  %v1032_v28 = vmul.f32 %v1649_v0, %v1031_v52  ;;  %v1046_v9 = vadd.f32 %v1026_v26, %v990_v39 }
 0x4d6   :  { %v1045_v37 = vadd.f32 %v1017_v20, %v989_v4 }
 0x4d7   :  { %v1050_v10 = vmul.f32 %v1046_v9, %v1982_v27  ;;  %v1066_v13 = vmul.f32 %v1046_v9, %v1987_v34  ;;  %v1085_v59 = vmul.f32 %v1046_v9, %v2011_v61 }
 0x4d8   :  { %v1655_v35 = vpop.eup %1654  ;;  %v1065_v54 = vmul.f32 %v1045_v37, %v2002_v6  ;;  %v1084_v52 = vmul.f32 %v1045_v37, %v2000_v62 }
 0x4d9   :  { %v1657_v14 = vpop.eup %1656  ;;  %v1036_v12 = vadd.f32 1.0, %v1655_v35  ;;  %v1039_v2 = vmul.f32 -0.5, %v1655_v35  ;;  %v1042_v36 = vand.u32 2147483647, %v1655_v35 }
 0x4da   :  { %v1029_v11 = vmul.f32 0.6931472, %v1657_v14  ;;  %v1049_v14 = vmul.f32 %v1045_v37, %v1979_v22  ;;  %v1069_v41 = vadd.f32 %v1066_v13, %v1065_v54  ;;  %v1088_v39 = vadd.f32 %v1085_v59, %v1084_v52 }
 0x4db   :  { %1658 = vlog2.f32 %v1036_v12  ;;  %v1040_v25 = vadd.f32 1.0, %v1039_v2  ;;  %vm1043_vm5 = vcmp.lt.f32.partialorder %v1042_v36, 0.0004427343 }
 0x4dc   :  { %v1035_v48 = vsel %vm1034_vm4, %v1032_v28, %v1029_v11  ;;  %v1053_v63 = vadd.f32 %v1050_v10, %v1049_v14 }
 0x4dd   :  { %v1047_v53 = vadd.f32 %v1035_v48, %v991_v40  ;;  %v1041_v46 = vmul.f32 %v1655_v35, %v1040_v25 }
 0x4df   :  { %v1051_v12 = vmul.f32 %v1047_v53, %v1992_v47  ;;  %v1067_v26 = vmul.f32 %v1047_v53, %v1998_v50  ;;  %v1086_v0 = vmul.f32 %v1047_v53, %v2013_v7 }
 0x4e1   :  { %v1659_v56 = vpop.eup %1658  ;;  %v1054_v28 = vadd.f32 %v1053_v63, %v1051_v12  ;;  %v1070_v2 = vadd.f32 %v1069_v41, %v1067_v26  ;;  %v1089_v4 = vadd.f32 %v1088_v39, %v1086_v0 }
 0x4e2   :  { %v1038_v11 = vmul.f32 0.6931472, %v1659_v56 }
 0x4e4   :  { %v1044_v38 = vsel %vm1043_vm5, %v1041_v46, %v1038_v11 }
 0x4e5   :  { %v1048_v20 = vadd.f32 %v1044_v38, %v992_v60 }
 0x4e7   :  { %v1052_v9 = vmul.f32 %v1048_v20, %v2004_v21  ;;  %v1068_v40 = vmul.f32 %v1048_v20, %v2007_v55  ;;  %v1087_v35 = vmul.f32 %v1048_v20, %v2025_v49 }
 0x4e9   :  { %v1055_v48 = vadd.f32 %v1054_v28, %v1052_v9  ;;  %v1071_v37 = vadd.f32 %v1070_v2, %v1068_v40  ;;  %v1090_v53 = vadd.f32 %v1089_v4, %v1087_v35 }
 0x4eb   :  { %v1056_v25 = vrot.slane %v1055_v48, 4  ;;  %v1072_v5 = vrot.slane %v1071_v37, 4  ;;  %v1091_v36 = vrot.slane %v1090_v53, 4 }
 0x4ed   :  { %v1057_v10 = vadd.f32 %v1056_v25, %v1055_v48  ;;  %v1073_v13 = vadd.f32 %v1072_v5, %v1071_v37  ;;  %v1092_v56 = vadd.f32 %v1091_v36, %v1090_v53 }
 0x4ef   :  { %v1058_v14 = vrot.slane %v1057_v10, 2  ;;  %v1074_v54 = vrot.slane %v1073_v13, 2  ;;  %v1093_v59 = vrot.slane %v1092_v56, 2 }
 0x4f1   :  { %v1059_v12 = vadd.f32 %v1058_v14, %v1057_v10  ;;  %v1075_v26 = vadd.f32 %v1074_v54, %v1073_v13  ;;  %v1094_v11 = vadd.f32 %v1093_v59, %v1092_v56 }
 0x4f3   :  { %v1060_v46 = vrot.slane %v1059_v12, 1  ;;  %v1076_v52 = vrot.slane %v1075_v26, 1  ;;  %v1095_v0 = vrot.slane %v1094_v11, 1 }
 0x4f5   :  { %v1061_v60 = vadd.f32 %v1060_v46, %v1059_v12  ;;  %v1077_v63 = vadd.f32 %v1076_v52, %v1075_v26  ;;  %v1096_v41 = vadd.f32 %v1095_v0, %v1094_v11 }
 0x4f7   :  { %v1062_v38 = vadd.f32 %v1061_v60, %v2030_v45  ;;  %v1078_v39 = vadd.f32 %v1077_v63, %v2030_v45  ;;  %v1097_v20 = vadd.f32 %v1096_v41, %v2030_v45 }
 0x4f9   :  { %v1063_v28 = vmul.f32 %v1062_v38, %v2032_v58  ;;  %v1079_v2 = vmul.f32 %v1078_v39, %v2032_v58  ;;  %v1098_v4 = vmul.f32 %v1097_v20, %v2032_v58 }
 0x4fb   :  { %v1081_v9 = vrot.slane %v1079_v2, 1  ;;  %v2327_v40 = vadd.f32 %v1063_v28, %v2261_v8  ;;  %v1100_v35 = vrot.slane %v1098_v4, 2 }
 0x4fd   :  { %v2330_v48 = vadd.f32 %v1081_v9, %v2264_v29  ;;  %v2333_v37 = vadd.f32 %v1100_v35, %v2267_v1  ;;  %v1103_v53 = vperm.slane %v2327_v40, 0 }
 0x4ff   :  { %v1107_v25 = vmul.f32 %v1103_v53, %v1878_v23  ;;  %v1112_v5 = vperm.slane %v2330_v48, 0  ;;  %v1121_v36 = vperm.slane %v2333_v37, 0  ;;  %v1106_v10 = vmul.f32 %v1103_v53, %v1890_v33 }
 0x500   :  { %v1105_v8 = vmul.f32 %v1103_v53, %v1859_v15  ;;  %v1104_v13 = vmul.f32 %v1103_v53, %v1867_v19 }
 0x501   :  { %v1111_v29 = vadd.f32 %v1107_v25, %v1880_v24  ;;  %v1116_v56 = vmul.f32 %v1112_v5, %v1863_v17  ;;  %v1110_v1 = vadd.f32 %v1106_v10, %v1888_v32  ;;  %v1115_v14 = vmul.f32 %v1112_v5, %v1861_v16  ;;  %v2525_v25 = vld [vmem:[#allocation8_spill] sm:$0xff] }
 0x502   :  { %v1109_v54 = vadd.f32 %v1105_v8, %v1897_v42  ;;  %v1114_v59 = vmul.f32 %v1112_v5, %v1901_v44  ;;  %v1125_v26 = vmul.f32 %v1121_v36, %v1865_v18  ;;  %v1108_v11 = vadd.f32 %v1104_v13, %v1917_v57  ;;  %v2528_v8 = vld [vmem:[#allocation14_spill] sm:$0xff] }
 0x503   :  { %v1120_v12 = vadd.f32 %v1116_v56, %v1111_v29  ;;  %v1113_v46 = vmul.f32 %v1112_v5, %v1906_v51  ;;  %v1119_v52 = vadd.f32 %v1115_v14, %v1110_v1  ;;  %v1124_v0 = vmul.f32 %v1121_v36, %v1886_v30  ;;  %v2526_v5 = vld [vmem:[#allocation9_spill] sm:$0xff] }
 0x504   :  { %v1118_v60 = vadd.f32 %v1114_v59, %v1109_v54  ;;  %v1123_v41 = vmul.f32 %v1121_v36, %v1899_v43  ;;  %v1122_v28 = vmul.f32 %v1121_v36, %v2503_v31  ;;  %v2527_v36 = vld [vmem:[#allocation10_spill] sm:$0xff]  ;;  %v2529_v14 = vld [vmem:[#allocation13_spill] sm:$0xff] }
 0x505   :  { %v1129_v63 = vadd.f32 %v1125_v26, %v1120_v12  ;;  %v1117_v38 = vadd.f32 %v1113_v46, %v1108_v11  ;;  %v1128_v39 = vadd.f32 %v1124_v0, %v1119_v52  ;;  %v2530_v52 = vld [vmem:[#allocation15_spill] sm:$0xff] }
 0x506   :  { %v1127_v20 = vadd.f32 %v1123_v41, %v1118_v60 }
 0x507   :  { %1660 = vtanh.f32 %v1129_v63  ;;  %v1126_v2 = vadd.f32 %v1122_v28, %v1117_v38 }
 0x508   :  { %1662 = vtanh.f32 %v1128_v39 }
 0x509   :  { %1664 = vtanh.f32 %v1127_v20 }
 0x50a   :  { %1666 = vtanh.f32 %v1126_v2 }
 0x50d   :  { %v1661_v4 = vpop.eup %1660 }
 0x50e   :  { %1146 = vmatpush.msrb.mxu1 %v1661_v4  ;;  %v1663_v9 = vpop.eup %1662  ;;  %v2531_v4 = vld [vmem:[#allocation16_spill] sm:$0xff] }
 0x50f   :  { %v1665_v35 = vpop.eup %1664 }
 0x510   :  { %1147 = vmatpush.msrb.mxu1 %v1663_v9  ;;  %v1667_v53 = vpop.eup %1666 }
 0x512   :  { %1148 = vmatpush.msrb.mxu1 %v1665_v35 }
 0x514   :  { %1149 = vmatpush.msrb.mxu1 %v1667_v53 }
 0x515   :  { %1492 = vmatmul.msk.f32.vlgmr.msrb.gmra.mxu1 %vm251_vm0, %v2205_v3 }
 0x51d   :  { %1493 = vmatmul.msk.f32.gmra.mxu1 %vm251_vm0, %v2525_v25 }
 0x525   :  { %1494 = vmatmul.msk.f32.gmra.mxu1 %vm251_vm0, %v2526_v5 }
 0x52d   :  { %1495 = vmatmul.msk.f32.gmra.mxu1 %vm251_vm0, %v2527_v36 }
 0x592   :  { %v1151_v10 = vpop.f32.mrf.mxu1 }
 0x593   :  { %v2363_v13 = vadd.f32 %v1151_v10, %v2528_v8 }
 0x595   :  { %v1167_v29 = vand.u32 2147483647, %v2363_v13 }
 0x597   :  { %v1171_v56 = vsub.f32 0.0, %v1167_v29 }
 0x599   :  { %v1175_v59 = vmul.f32 1.442695, %v1171_v56 }
 0x59a   :  { %v1154_v1 = vpop.f32.mrf.mxu1 }
 0x59b   :  { %v1155_v54 = vadd.f32 %v1154_v1, %v2529_v14  ;;  %1668 = vpow2.f32 %v1175_v59 }
 0x59d   :  { %v1168_v12 = vand.u32 2147483647, %v1155_v54 }
 0x59f   :  { %v1172_v26 = vsub.f32 0.0, %v1168_v12 }
 0x5a1   :  { %v1177_v11 = vmul.f32 1.442695, %v1172_v26  ;;  %v1669_v63 = vpop.eup %1668 }
 0x5a2   :  { %v1157_v46 = vpop.f32.mrf.mxu1  ;;  %v1183_v20 = vadd.f32 1.0, %v1669_v63  ;;  %v1186_v56 = vmul.f32 -0.5, %v1669_v63 }
 0x5a3   :  { %1670 = vpow2.f32 %v1177_v11  ;;  %v1158_v0 = vadd.f32 %v1157_v46, %v2530_v52 }
 0x5a5   :  { %v1169_v60 = vand.u32 2147483647, %v1158_v0 }
 0x5a7   :  { %v1173_v41 = vsub.f32 0.0, %v1169_v60  ;;  %v1187_v60 = vadd.f32 1.0, %v1186_v56  ;;  %v1163_v56 = vmax.f32 %v2363_v13, 0.0 }
 0x5a9   :  { %v1671_v38 = vpop.eup %1670  ;;  %v1179_v39 = vmul.f32 1.442695, %v1173_v41  ;;  %v1188_v14 = vmul.f32 %v1669_v63, %v1187_v60 }
 0x5aa   :  { %v1192_v28 = vadd.f32 1.0, %v1671_v38  ;;  %v1160_v2 = vpop.f32.mrf.mxu1  ;;  %v1195_v10 = vmul.f32 -0.5, %v1671_v38  ;;  %v1198_v41 = vand.u32 2147483647, %v1671_v38 }
 0x5ab   :  { %1672 = vpow2.f32 %v1179_v39  ;;  %v2369_v9 = vadd.f32 %v1160_v2, %v2531_v4  ;;  %v1189_v39 = vand.u32 2147483647, %v1669_v63 }
 0x5ac   :  { %1674 = vlog2.f32 %v1192_v28  ;;  %v1196_v46 = vadd.f32 1.0, %v1195_v10  ;;  %vm1199_vm6 = vcmp.lt.f32.partialorder %v1198_v41, 0.0004427343 }
 0x5ad   :  { %v1170_v35 = vand.u32 2147483647, %v2369_v9  ;;  %1676 = vlog2.f32 %v1183_v20  ;;  %vm1190_vm7 = vcmp.lt.f32.partialorder %v1189_v39, 0.0004427343  ;;  %v1166_v39 = vmax.f32 %v2369_v9, 0.0 }
 0x5ae   :  { %v1197_v52 = vmul.f32 %v1671_v38, %v1196_v46 }
 0x5af   :  { %v1174_v53 = vsub.f32 0.0, %v1170_v35 }
 0x5b1   :  { %v1673_v29 = vpop.eup %1672  ;;  %v1181_v1 = vmul.f32 1.442695, %v1174_v53  ;;  %v1164_v53 = vmax.f32 %v1155_v54, 0.0 }
 0x5b2   :  { %v1201_v59 = vadd.f32 1.0, %v1673_v29  ;;  %v1675_v12 = vpop.eup %1674  ;;  %v1204_v26 = vmul.f32 -0.5, %v1673_v29  ;;  %v1207_v20 = vand.u32 2147483647, %v1673_v29 }
 0x5b3   :  { %1678 = vpow2.f32 %v1181_v1  ;;  %v1677_v11 = vpop.eup %1676  ;;  %v1194_v2 = vmul.f32 0.6931472, %v1675_v12 }
 0x5b4   :  { %1680 = vlog2.f32 %v1201_v59  ;;  %v1185_v28 = vmul.f32 0.6931472, %v1677_v11  ;;  %v1205_v4 = vadd.f32 1.0, %v1204_v26  ;;  %vm1208_vm8 = vcmp.lt.f32.partialorder %v1207_v20, 0.0004427343 }
 0x5b5   :  { %v1200_v36 = vsel %vm1199_vm6, %v1197_v52, %v1194_v2  ;;  %v1165_v26 = vmax.f32 %v1158_v0, 0.0 }
 0x5b6   :  { %v1191_v1 = vsel %vm1190_vm7, %v1188_v14, %v1185_v28  ;;  %v1206_v10 = vmul.f32 %v1673_v29, %v1205_v4  ;;  %v1220_v12 = vadd.f32 %v1200_v36, %v1164_v53 }
 0x5b7   :  { %v1219_v11 = vadd.f32 %v1191_v1, %v1163_v56 }
 0x5b8   :  { %v1224_v41 = vmul.f32 %v1220_v12, %v1982_v27  ;;  %v1240_v54 = vmul.f32 %v1220_v12, %v1987_v34  ;;  %v1259_v13 = vmul.f32 %v1220_v12, %v2011_v61 }
 0x5b9   :  { %v1679_v35 = vpop.eup %1678  ;;  %v1239_v14 = vmul.f32 %v1219_v11, %v2002_v6  ;;  %v1258_v4 = vmul.f32 %v1219_v11, %v2000_v62 }
 0x5ba   :  { %v1681_v8 = vpop.eup %1680  ;;  %v1210_v5 = vadd.f32 1.0, %v1679_v35  ;;  %v1213_v59 = vmul.f32 -0.5, %v1679_v35  ;;  %v1216_v60 = vand.u32 2147483647, %v1679_v35 }
 0x5bb   :  { %v1203_v25 = vmul.f32 0.6931472, %v1681_v8  ;;  %v1223_v8 = vmul.f32 %v1219_v11, %v1979_v22  ;;  %v1243_v28 = vadd.f32 %v1240_v54, %v1239_v14  ;;  %v1262_v53 = vadd.f32 %v1259_v13, %v1258_v4 }
 0x5bc   :  { %1682 = vlog2.f32 %v1210_v5  ;;  %v1214_v63 = vadd.f32 1.0, %v1213_v59  ;;  %vm1217_vm9 = vcmp.lt.f32.partialorder %v1216_v60, 0.0004427343 }
 0x5bd   :  { %v1209_v38 = vsel %vm1208_vm8, %v1206_v10, %v1203_v25  ;;  %v1227_v2 = vadd.f32 %v1224_v41, %v1223_v8 }
 0x5be   :  { %v1221_v46 = vadd.f32 %v1209_v38, %v1165_v26  ;;  %v1215_v0 = vmul.f32 %v1679_v35, %v1214_v63 }
 0x5c0   :  { %v1225_v5 = vmul.f32 %v1221_v46, %v1992_v47  ;;  %v1241_v36 = vmul.f32 %v1221_v46, %v1998_v50  ;;  %v1260_v29 = vmul.f32 %v1221_v46, %v2013_v7 }
 0x5c2   :  { %v1683_v52 = vpop.eup %1682  ;;  %v1228_v10 = vadd.f32 %v1227_v2, %v1225_v5  ;;  %v1244_v59 = vadd.f32 %v1243_v28, %v1241_v36  ;;  %v1263_v56 = vadd.f32 %v1262_v53, %v1260_v29 }
 0x5c3   :  { %v1212_v25 = vmul.f32 0.6931472, %v1683_v52 }
 0x5c5   :  { %v1218_v20 = vsel %vm1217_vm9, %v1215_v0, %v1212_v25 }
 0x5c6   :  { %v1222_v1 = vadd.f32 %v1218_v20, %v1166_v39 }
 0x5c8   :  { %v1226_v12 = vmul.f32 %v1222_v1, %v2004_v21  ;;  %v1242_v26 = vmul.f32 %v1222_v1, %v2007_v55  ;;  %v1261_v35 = vmul.f32 %v1222_v1, %v2025_v49 }
 0x5ca   :  { %v1229_v38 = vadd.f32 %v1228_v10, %v1226_v12  ;;  %v1245_v11 = vadd.f32 %v1244_v59, %v1242_v26  ;;  %v1264_v46 = vadd.f32 %v1263_v56, %v1261_v35 }
 0x5cc   :  { %v1230_v63 = vrot.slane %v1229_v38, 4  ;;  %v1246_v9 = vrot.slane %v1245_v11, 4  ;;  %v1265_v60 = vrot.slane %v1264_v46, 4 }
 0x5ce   :  { %v1231_v41 = vadd.f32 %v1230_v63, %v1229_v38  ;;  %v1247_v54 = vadd.f32 %v1246_v9, %v1245_v11  ;;  %v1266_v52 = vadd.f32 %v1265_v60, %v1264_v46 }
 0x5d0   :  { %v1232_v8 = vrot.slane %v1231_v41, 2  ;;  %v1248_v14 = vrot.slane %v1247_v54, 2  ;;  %v1267_v13 = vrot.slane %v1266_v52, 2 }
 0x5d2   :  { %v1233_v5 = vadd.f32 %v1232_v8, %v1231_v41  ;;  %v1249_v36 = vadd.f32 %v1248_v14, %v1247_v54  ;;  %v1268_v25 = vadd.f32 %v1267_v13, %v1266_v52 }
 0x5d4   :  { %v1234_v0 = vrot.slane %v1233_v5, 1  ;;  %v1250_v4 = vrot.slane %v1249_v36, 1  ;;  %v1269_v29 = vrot.slane %v1268_v25, 1 }
 0x5d6   :  { %v1235_v39 = vadd.f32 %v1234_v0, %v1233_v5  ;;  %v1251_v2 = vadd.f32 %v1250_v4, %v1249_v36  ;;  %v1270_v28 = vadd.f32 %v1269_v29, %v1268_v25  ;;  %v2533_v4 = vld [vmem:[#allocation9_spill] sm:$0xff] }
 0x5d8   :  { %v1236_v20 = vadd.f32 %v1235_v39, %v2030_v45  ;;  %v1252_v53 = vadd.f32 %v1251_v2, %v2030_v45  ;;  %v1271_v1 = vadd.f32 %v1270_v28, %v2030_v45  ;;  %v2535_v39 = vld [vmem:[#allocation14_spill] sm:$0xff] }
 0x5da   :  { %v1237_v10 = vmul.f32 %v1236_v20, %v2032_v58  ;;  %v1253_v59 = vmul.f32 %v1252_v53, %v2032_v58  ;;  %v1272_v56 = vmul.f32 %v1271_v1, %v2032_v58  ;;  %v2536_v1 = vld [vmem:[#allocation13_spill] sm:$0xff] }
 0x5dc   :  { %v1255_v12 = vrot.slane %v1253_v59, 1  ;;  %v2393_v26 = vadd.f32 %v1237_v10, %v2327_v40  ;;  %v1274_v35 = vrot.slane %v1272_v56, 2 }
 0x5de   :  { %v2396_v38 = vadd.f32 %v1255_v12, %v2330_v48  ;;  %v2399_v11 = vadd.f32 %v1274_v35, %v2333_v37  ;;  %v1277_v46 = vperm.slane %v2393_v26, 0 }
 0x5e0   :  { %v1281_v63 = vmul.f32 %v1277_v46, %v1878_v23  ;;  %v1286_v9 = vperm.slane %v2396_v38, 0  ;;  %v1295_v60 = vperm.slane %v2399_v11, 0  ;;  %v1280_v41 = vmul.f32 %v1277_v46, %v1890_v33 }
 0x5e1   :  { %v1279_v40 = vmul.f32 %v1277_v46, %v1859_v15  ;;  %v1278_v54 = vmul.f32 %v1277_v46, %v1867_v19  ;;  %v2537_v46 = vld [vmem:[#allocation15_spill] sm:$0xff] }
 0x5e2   :  { %v1285_v48 = vadd.f32 %v1281_v63, %v1880_v24  ;;  %v1290_v52 = vmul.f32 %v1286_v9, %v1863_v17  ;;  %v1284_v37 = vadd.f32 %v1280_v41, %v1888_v32  ;;  %v1289_v8 = vmul.f32 %v1286_v9, %v1861_v16 }
 0x5e3   :  { %v1283_v23 = vadd.f32 %v1279_v40, %v1897_v42  ;;  %v1288_v14 = vmul.f32 %v1286_v9, %v1901_v44  ;;  %v1299_v5 = vmul.f32 %v1295_v60, %v1865_v18  ;;  %v1282_v33 = vadd.f32 %v1278_v54, %v1917_v57 }
 0x5e4   :  { %v1294_v13 = vadd.f32 %v1290_v52, %v1285_v48  ;;  %v1287_v15 = vmul.f32 %v1286_v9, %v1906_v51  ;;  %v1293_v19 = vadd.f32 %v1289_v8, %v1284_v37  ;;  %v1298_v24 = vmul.f32 %v1295_v60, %v1886_v30  ;;  %v2538_v8 = vld [vmem:[#allocation16_spill] sm:$0xff] }
 0x5e5   :  { %v1292_v36 = vadd.f32 %v1288_v14, %v1283_v23  ;;  %v1297_v32 = vmul.f32 %v1295_v60, %v1899_v43  ;;  %v1296_v44 = vmul.f32 %v1295_v60, %v2503_v31  ;;  %v2532_v43 = vld [vmem:[#allocation8_spill] sm:$0xff]  ;;  %v2534_v31 = vld [vmem:[#allocation10_spill] sm:$0xff] }
 0x5e6   :  { %v1303_v17 = vadd.f32 %v1299_v5, %v1294_v13  ;;  %v1291_v25 = vadd.f32 %v1287_v15, %v1282_v33  ;;  %v1302_v16 = vadd.f32 %v1298_v24, %v1293_v19 }
 0x5e7   :  { %v1301_v42 = vadd.f32 %v1297_v32, %v1292_v36 }
 0x5e8   :  { %1684 = vtanh.f32 %v1303_v17  ;;  %v1300_v0 = vadd.f32 %v1296_v44, %v1291_v25 }
 0x5e9   :  { %1686 = vtanh.f32 %v1302_v16 }
 0x5ea   :  { %1688 = vtanh.f32 %v1301_v42 }
 0x5eb   :  { %1690 = vtanh.f32 %v1300_v0 }
 0x5ee   :  { %v1685_v18 = vpop.eup %1684 }
 0x5ef   :  { %1320 = vmatpush.msrb.mxu2 %v1685_v18  ;;  %v1687_v51 = vpop.eup %1686 }
 0x5f0   :  { %v1689_v57 = vpop.eup %1688 }
 0x5f1   :  { %1321 = vmatpush.msrb.mxu2 %v1687_v51  ;;  %v1691_v30 = vpop.eup %1690 }
 0x5f3   :  { %1322 = vmatpush.msrb.mxu2 %v1689_v57 }
 0x5f5   :  { %1323 = vmatpush.msrb.mxu2 %v1691_v30 }
 0x5f6   :  { %1496 = vmatmul.msk.f32.vlgmr.msrb.gmra.mxu2 %vm251_vm0, %v2205_v3 }
 0x5fe   :  { %1497 = vmatmul.msk.f32.gmra.mxu2 %vm251_vm0, %v2532_v43 }
 0x606   :  { %1498 = vmatmul.msk.f32.gmra.mxu2 %vm251_vm0, %v2533_v4 }
 0x60e   :  { %1499 = vmatmul.msk.f32.gmra.mxu2 %vm251_vm0, %v2534_v31 }
 0x679   :  { %v1325_v29 = vpop.f32.mrf.mxu2 }
 0x67a   :  { %v2429_v2 = vadd.f32 %v1325_v29, %v2535_v39 }
 0x67c   :  { %v1341_v28 = vand.u32 2147483647, %v2429_v2 }
 0x67e   :  { %v1345_v20 = vsub.f32 0.0, %v1341_v28 }
 0x680   :  { %v1349_v3 = vmul.f32 1.442695, %v1345_v20 }
 0x681   :  { %v1328_v53 = vpop.f32.mrf.mxu2 }
 0x682   :  { %v1329_v10 = vadd.f32 %v1328_v53, %v2536_v1  ;;  %1692 = vpow2.f32 %v1349_v3 }
 0x684   :  { %v1342_v59 = vand.u32 2147483647, %v1329_v10  ;;  %v1338_v29 = vmax.f32 %v1329_v10, 0.0 }
 0x686   :  { %v1346_v56 = vsub.f32 0.0, %v1342_v59  ;;  %v1337_v59 = vmax.f32 %v2429_v2, 0.0 }
 0x688   :  { %v1351_v12 = vmul.f32 1.442695, %v1346_v56  ;;  %v1693_v60 = vpop.eup %1692 }
 0x689   :  { %v1331_v35 = vpop.f32.mrf.mxu2  ;;  %v1357_v48 = vadd.f32 1.0, %v1693_v60  ;;  %v1360_v15 = vmul.f32 -0.5, %v1693_v60  ;;  %v1363_v44 = vand.u32 2147483647, %v1693_v60 }
 0x68a   :  { %1694 = vpow2.f32 %v1351_v12  ;;  %v1332_v63 = vadd.f32 %v1331_v35, %v2537_v46 }
 0x68b   :  { %v1361_v16 = vadd.f32 1.0, %v1360_v15  ;;  %vm1364_vm10 = vcmp.lt.f32.partialorder %v1363_v44, 0.0004427343 }
 0x68c   :  { %v1343_v9 = vand.u32 2147483647, %v1332_v63  ;;  %v1339_v12 = vmax.f32 %v1332_v63, 0.0 }
 0x68d   :  { %v1362_v4 = vmul.f32 %v1693_v60, %v1361_v16 }
 0x68e   :  { %v1347_v41 = vsub.f32 0.0, %v1343_v9 }
 0x690   :  { %v1695_v40 = vpop.eup %1694  ;;  %v1353_v54 = vmul.f32 1.442695, %v1347_v41 }
 0x691   :  { %v1366_v52 = vadd.f32 1.0, %v1695_v40  ;;  %v1334_v37 = vpop.f32.mrf.mxu2  ;;  %v1369_v5 = vmul.f32 -0.5, %v1695_v40  ;;  %v1372_v42 = vand.u32 2147483647, %v1695_v40 }
 0x692   :  { %1696 = vpow2.f32 %v1353_v54  ;;  %v2435_v23 = vadd.f32 %v1334_v37, %v2538_v8 }
 0x693   :  { %1698 = vlog2.f32 %v1366_v52  ;;  %v1370_v25 = vadd.f32 1.0, %v1369_v5  ;;  %vm1373_vm0 = vcmp.lt.f32.partialorder %v1372_v42, 0.0004427343 }
 0x694   :  { %v1344_v14 = vand.u32 2147483647, %v2435_v23  ;;  %1700 = vlog2.f32 %v1357_v48 }
 0x695   :  { %v1371_v57 = vmul.f32 %v1695_v40, %v1370_v25 }
 0x696   :  { %v1348_v13 = vsub.f32 0.0, %v1344_v14 }
 0x698   :  { %v1697_v33 = vpop.eup %1696  ;;  %v1355_v19 = vmul.f32 1.442695, %v1348_v13 }
 0x699   :  { %v1375_v24 = vadd.f32 1.0, %v1697_v33  ;;  %v1699_v36 = vpop.eup %1698  ;;  %v1378_v17 = vmul.f32 -0.5, %v1697_v33  ;;  %v1381_v30 = vand.u32 2147483647, %v1697_v33 }
 0x69a   :  { %1702 = vpow2.f32 %v1355_v19  ;;  %v1701_v32 = vpop.eup %1700  ;;  %v1368_v0 = vmul.f32 0.6931472, %v1699_v36 }
 0x69b   :  { %1704 = vlog2.f32 %v1375_v24  ;;  %v1359_v18 = vmul.f32 0.6931472, %v1701_v32  ;;  %v1379_v51 = vadd.f32 1.0, %v1378_v17  ;;  %vm1382_vm11 = vcmp.lt.f32.partialorder %v1381_v30, 0.0004427343 }
 0x69c   :  { %v1374_v39 = vsel %vm1373_vm0, %v1371_v57, %v1368_v0 }
 0x69d   :  { %v1365_v20 = vsel %vm1364_vm10, %v1362_v4, %v1359_v18  ;;  %v1380_v1 = vmul.f32 %v1697_v33, %v1379_v51  ;;  %v1394_v56 = vadd.f32 %v1374_v39, %v1338_v29 }
 0x69e   :  { %v1393_v46 = vadd.f32 %v1365_v20, %v1337_v59 }
 0x69f   :  { %v1398_v40 = vmul.f32 %v1394_v56, %v1982_v27  ;;  %v1414_v10 = vmul.f32 %v1394_v56, %v1987_v34  ;;  %v1433_v2 = vmul.f32 %v1394_v56, %v2011_v61  ;;  %v1340_v27 = vmax.f32 %v2435_v23, 0.0 }
 0x6a0   :  { %v1703_v43 = vpop.eup %1702  ;;  %v1397_v48 = vmul.f32 %v1393_v46, %v1979_v22  ;;  %v1413_v52 = vmul.f32 %v1393_v46, %v2002_v6  ;;  %v1432_v13 = vmul.f32 %v1393_v46, %v2000_v62 }
 0x6a1   :  { %v1705_v31 = vpop.eup %1704  ;;  %v1384_v28 = vadd.f32 1.0, %v1703_v43  ;;  %v1387_v3 = vmul.f32 -0.5, %v1703_v43  ;;  %v1390_v41 = vand.u32 2147483647, %v1703_v43 }
 0x6a2   :  { %v1377_v53 = vmul.f32 0.6931472, %v1705_v31  ;;  %v1401_v34 = vadd.f32 %v1398_v40, %v1397_v48  ;;  %v1417_v33 = vadd.f32 %v1414_v10, %v1413_v52  ;;  %v1436_v15 = vadd.f32 %v1433_v2, %v1432_v13 }
 0x6a3   :  { %1706 = vlog2.f32 %v1384_v28  ;;  %v1388_v60 = vadd.f32 1.0, %v1387_v3  ;;  %vm1391_vm12 = vcmp.lt.f32.partialorder %v1390_v41, 0.0004427343 }
 0x6a4   :  { %v1383_v35 = vsel %vm1382_vm11, %v1380_v1, %v1377_v53 }
 0x6a5   :  { %v1395_v9 = vadd.f32 %v1383_v35, %v1339_v12  ;;  %v1389_v14 = vmul.f32 %v1703_v43, %v1388_v60 }
 0x6a7   :  { %v1399_v37 = vmul.f32 %v1395_v9, %v1992_v47  ;;  %v1415_v63 = vmul.f32 %v1395_v9, %v1998_v50  ;;  %v1434_v5 = vmul.f32 %v1395_v9, %v2013_v7 }
 0x6a9   :  { %v1707_v54 = vpop.eup %1706  ;;  %v1402_v19 = vadd.f32 %v1401_v34, %v1399_v37  ;;  %v1418_v61 = vadd.f32 %v1417_v33, %v1415_v63  ;;  %v1437_v24 = vadd.f32 %v1436_v15, %v1434_v5 }
 0x6aa   :  { %v1386_v8 = vmul.f32 0.6931472, %v1707_v54 }
 0x6ac   :  { %v1392_v22 = vsel %vm1391_vm12, %v1389_v14, %v1386_v8 }
 0x6ad   :  { %v1396_v6 = vadd.f32 %v1392_v22, %v1340_v27 }
 0x6af   :  { %v1400_v47 = vmul.f32 %v1396_v6, %v2004_v21  ;;  %v1416_v50 = vmul.f32 %v1396_v6, %v2007_v55  ;;  %v1435_v36 = vmul.f32 %v1396_v6, %v2025_v49 }
 0x6b1   :  { %v1403_v62 = vadd.f32 %v1402_v19, %v1400_v47  ;;  %v1419_v17 = vadd.f32 %v1418_v61, %v1416_v50  ;;  %v1438_v7 = vadd.f32 %v1437_v24, %v1435_v36 }
 0x6b3   :  { %v1404_v32 = vrot.slane %v1403_v62, 4  ;;  %v1420_v23 = vrot.slane %v1419_v17, 4  ;;  %v1439_v25 = vrot.slane %v1438_v7, 4 }
 0x6b5   :  { %v1405_v16 = vadd.f32 %v1404_v32, %v1403_v62  ;;  %v1421_v42 = vadd.f32 %v1420_v23, %v1419_v17  ;;  %v1440_v44 = vadd.f32 %v1439_v25, %v1438_v7 }
 0x6b7   :  { %v1406_v0 = vrot.slane %v1405_v16, 2  ;;  %v1422_v18 = vrot.slane %v1421_v42, 2  ;;  %v1441_v51 = vrot.slane %v1440_v44, 2 }
 0x6b9   :  { %v1407_v57 = vadd.f32 %v1406_v0, %v1405_v16  ;;  %v1423_v30 = vadd.f32 %v1422_v18, %v1421_v42  ;;  %v1442_v43 = vadd.f32 %v1441_v51, %v1440_v44 }
 0x6bb   :  { %v1408_v21 = vrot.slane %v1407_v57, 1  ;;  %v1424_v4 = vrot.slane %v1423_v30, 1  ;;  %v1443_v55 = vrot.slane %v1442_v43, 1 }
 0x6bd   :  { %v1409_v31 = vadd.f32 %v1408_v21, %v1407_v57  ;;  %v1425_v49 = vadd.f32 %v1424_v4, %v1423_v30  ;;  %v1444_v29 = vadd.f32 %v1443_v55, %v1442_v43 }
 0x6bf   :  { %v1410_v39 = vadd.f32 %v1409_v31, %v2030_v45  ;;  %v1426_v28 = vadd.f32 %v1425_v49, %v2030_v45  ;;  %v1445_v20 = vadd.f32 %v1444_v29, %v2030_v45 }
 0x6c1   :  { %v1411_v53 = vmul.f32 %v1410_v39, %v2032_v58  ;;  %v1427_v1 = vmul.f32 %v1426_v28, %v2032_v58  ;;  %v1446_v3 = vmul.f32 %v1445_v20, %v2032_v58 }
 0x6c3   :  { %v1412_v59 = vadd.f32 %v1411_v53, %v2393_v26  ;;  %v1429_v56 = vrot.slane %v1427_v1, 1  ;;  %v1448_v12 = vrot.slane %v1446_v3, 2 }
 0x6c5   :  { %v1431_v35 = vadd.f32 %v1429_v56, %v2396_v38  ;;  %v1450_v45 = vadd.f32 %v1448_v12, %v2399_v11  ;;  %1451 = vst [vmem:[#allocation5] sm:$0x1] %v1412_v59 }
 0x6c7   :  { %1452 = vst [vmem:[#allocation5 + $0x1] sm:$0x1] %v1431_v35 }
 0x6c8   :  { %1453 = vst [vmem:[#allocation5 + $0x2] sm:$0x1] %v1450_v45 }
 0x6c9   :  { %1464 = dma.vmem_to_hbm [thread:$0]  %s1460_s5, 64, %s1462_s21, [#allocation3]  }
 0x6ca   :  { %1750 = dma.done.wait [#allocation3], 64  }
 0x6cb   :  { %1751 = vsyncadd [#allocation3], 4294967232 }
 0x6cc   :  { %1469 = vsyncpa [#allocation3], 1 }
 0x6cd   :  { %1470 = vsyncpa [#allocation4], 1 }

</bundles_post_ra>
